<compile_context>
chip_gen: v5e
topology: v5e:2x2
jax: 0.10.0
libtpu: 0.0.40
codegen_flags: <defaults>
</compile_context>

<pallas_src>
import math

import jax
import jax.numpy as jnp
from jax.experimental import pallas as pl
from jax.experimental.pallas import tpu as pltpu

# ----- config (mirrors cfg.model / cfg.data), small shapes -------------------
NUM_LAYERS = 2            # cfg.model.num_layers
D_MODEL = 32              # cfg.model.d_model
NUM_HEADS = 2             # cfg.model.num_heads
DIM_FF = 64               # cfg.model.dim_feedforward
NUM_FF_RESID = 1          # cfg.model.num_output_FFresiduals
TIME_SCALE_FACTOR = 1000  # cfg.model.time_scale_factor
TEMB_DIM = 16             # cfg.model.temb_dim
S = 16                    # cfg.data.S (state space size)
MAX_LEN = 8               # cfg.data.shape[0] == D (sequence length)
HEAD_DIM = D_MODEL // NUM_HEADS
LN_EPS = 1e-5

NLR = NUM_LAYERS + NUM_FF_RESID            # number of FF blocks
NUM_LN = 2 * NUM_LAYERS + NUM_FF_RESID     # number of LayerNorms (fused FiLM sets)

# packed-bias row layout (each row padded to 128 lanes)
ROW_EMB_B = 0
ROW_OUT_B = 1
ROW_ATT0 = 2                                # 2 rows per attention block
ROW_FF0 = ROW_ATT0 + 2 * NUM_LAYERS         # 2 rows per FF block (layers + resid)
_BIAS_ROWS_RAW = ROW_FF0 + 2 * NLR
BIAS_ROWS = ((_BIAS_ROWS_RAW + 7) // 8) * 8


# ----- kernel-side encoder math ----------------------------------------------
def _encoder_forward(tok, pe, film, wqkv, wo, wff1, wff2, emb_w, out_w, bias):
    """Batched transformer encoder (kernel body math).

    tok:  (N, 1) int32 tokens, N = TB * L       pe: (L, D)
    film: (TB, NUM_LN, 2, D) fused (LN affine x FiLM) gamma'/beta'
    wqkv: (NL, D, 3D)  wo: (NL, D, D)           (q columns pre-scaled by 1/sqrt(hd))
    wff1: (NLR, D, DFF)  wff2: (NLR, DFF, D)
    emb_w: (S, D)  out_w: (D, S)  bias: (BIAS_ROWS, 128)
    Weight args may be Pallas Refs (static indexing only).  Returns (TB, L, S).
    """
    L, D, H, hd = MAX_LEN, D_MODEL, NUM_HEADS, HEAD_DIM
    TB = film.shape[0]
    N = TB * L

    def brow(r, w):                       # one packed bias row -> (1, w)
        return bias[r:r + 1, 0:w]

    def ln_film(x2, idx):                 # post-LN + fused FiLM, x2: (N, D)
        x = x2.reshape(TB, L, D)          # free leading-dim split (L == 8 sublanes)
        mu = jnp.mean(x, axis=-1, keepdims=True)
        xc = x - mu
        var = jnp.mean(xc * xc, axis=-1, keepdims=True)
        xn = xc * jax.lax.rsqrt(var + LN_EPS)
        g = film[:, idx, 0, :][:, None, :]          # (TB, 1, D) broadcast over L
        b = film[:, idx, 1, :][:, None, :]
        return (xn * g + b).reshape(N, D)

    def ff_block(x2, ff_idx, ln_idx):
        f0 = ROW_FF0 + 2 * ff_idx
        h1 = jnp.dot(x2, wff1[ff_idx], preferred_element_type=jnp.float32)
        h1 = jnp.maximum(h1 + brow(f0 + 0, DIM_FF), 0.0)
        ff = jnp.dot(h1, wff2[ff_idx], preferred_element_type=jnp.float32)
        ff = ff + brow(f0 + 1, D)
        return ln_film(x2 + ff, ln_idx)

    # ---- one-hot rebuilt in-kernel (VPU iota + compare) ----------------------
    one_hot = (jax.lax.broadcasted_iota(jnp.int32, (N, S), 1) == tok
               ).astype(jnp.float32)                               # (N, S)

    # ---- input embedding + positional encoding ------------------------------
    x = jnp.dot(one_hot, emb_w[...], preferred_element_type=jnp.float32)
    x = x + brow(ROW_EMB_B, D)
    x = (x.reshape(TB, L, D) + pe[None, :, :]).reshape(N, D)

    ln_idx = 0
    for l in range(NUM_LAYERS):
        # ---- fused QKV projection + multi-head self-attention ---------------
        a0 = ROW_ATT0 + 2 * l
        qkv = jnp.dot(x, wqkv[l], preferred_element_type=jnp.float32)
        qkv = qkv + brow(a0 + 0, 3 * D)
        q3 = qkv[:, 0 * D:1 * D].reshape(TB, L, D)
        k3 = qkv[:, 1 * D:2 * D].reshape(TB, L, D)
        v3 = qkv[:, 2 * D:3 * D].reshape(TB, L, D)

        # heads stacked along the leading dim -> one softmax chain, one PV matmul
        s = jnp.concatenate(
            [jnp.einsum('bqd,bkd->bqk',
                        q3[..., h * hd:(h + 1) * hd],
                        k3[..., h * hd:(h + 1) * hd],
                        preferred_element_type=jnp.float32)
             for h in range(H)], axis=0)                           # (H*TB, L, L)
        vh = jnp.concatenate(
            [v3[..., h * hd:(h + 1) * hd] for h in range(H)], axis=0)  # (H*TB, L, hd)
        s = s - jnp.max(s, axis=-1, keepdims=True)
        p = jnp.exp(s)
        p = p * pl.reciprocal(jnp.sum(p, axis=-1, keepdims=True), approx=True)
        o = jnp.einsum('bqk,bkd->bqd', p, vh,
                       preferred_element_type=jnp.float32)         # (H*TB, L, hd)
        sa = jnp.concatenate([o[h * TB:(h + 1) * TB] for h in range(H)],
                             axis=-1).reshape(N, D)
        sa = jnp.dot(sa, wo[l], preferred_element_type=jnp.float32)
        sa = sa + brow(a0 + 1, D)

        x = ln_film(x + sa, ln_idx); ln_idx += 1
        x = ff_block(x, l, ln_idx); ln_idx += 1

    # ---- output FF residual blocks -------------------------------------------
    for r in range(NUM_FF_RESID):
        x = ff_block(x, NUM_LAYERS + r, ln_idx); ln_idx += 1

    # ---- output projection + one-hot skip (reused one-hot) -------------------
    logits = jnp.dot(x, out_w[...], preferred_element_type=jnp.float32)
    logits = logits + brow(ROW_OUT_B, S) + one_hot
    return logits.reshape(TB, L, S)


# ----- Pallas kernel ----------------------------------------------------------
def transformer_kernel(tok_ref, pe_ref, film_ref,
                       wqkv_ref, wo_ref, wff1_ref, wff2_ref,
                       emb_w_ref, out_w_ref, bias_ref, out_ref):
    logits3 = _encoder_forward(
        tok_ref[...], pe_ref[...], film_ref[...],
        wqkv_ref, wo_ref, wff1_ref, wff2_ref,
        emb_w_ref, out_w_ref, bias_ref)                     # (TB, L, S)
    # Lane-dense (TB, L*S) = (TB, 128) store.
    # TODO(synk): a single reshape(TB, L*S) would be one relayout, but lane-dim-
    # changing reshapes are not reliably lowered by Mosaic; keep the known-good
    # per-position slice + concat.
    out_ref[...] = jnp.concatenate(
        [logits3[:, i, :] for i in range(MAX_LEN)], axis=-1)


# ----- host-side glue ---------------------------------------------------------
def _positional_encoding(max_len, d_model):
    position = jnp.arange(max_len, dtype=jnp.float32)[:, None]
    div_term = jnp.exp(jnp.arange(0, d_model, 2, dtype=jnp.float32)
                       * (-math.log(10000.0) / d_model))
    pe = jnp.zeros((max_len, d_model), jnp.float32)
    pe = pe.at[:, 0::2].set(jnp.sin(position * div_term))
    pe = pe.at[:, 1::2].set(jnp.cos(position * div_term))
    return pe


def _timestep_embedding(timesteps, embedding_dim, max_positions=10000):
    half_dim = embedding_dim // 2
    emb = math.log(max_positions) / (half_dim - 1)
    freqs = jnp.exp(jnp.arange(half_dim, dtype=jnp.float32) * -emb)
    args = timesteps.astype(jnp.float32)[:, None] * freqs[None, :]
    return jnp.concatenate([jnp.sin(args), jnp.cos(args)], axis=1)


def _prepare_inputs(params, x_tokens, times):
    """x.long(), times.long(), int32 token column, pos-enc table, temb MLP,
    and FiLM hoisted + fused with the LayerNorm affine (per batch, per LN)."""
    D = D_MODEL
    x_tokens = x_tokens.astype(jnp.int32)                      # x.long()
    times = times.astype(jnp.int32)                            # times.long()
    tok_col = x_tokens.reshape(-1, 1)                          # (B*L, 1) int32
    pe = _positional_encoding(MAX_LEN, D)                      # (L, D)

    # temb_net(transformer_timestep_embedding(times * time_scale_factor, temb_dim))
    t_emb = _timestep_embedding(
        (times * TIME_SCALE_FACTOR).astype(jnp.float32), TEMB_DIM)
    h = jnp.maximum(t_emb @ params["temb1_w"].T + params["temb1_b"], 0.0)
    temb = h @ params["temb2_w"].T + params["temb2_b"]         # (B, 4*TEMB)

    # Fused post-LN affine:  f_scale*(xn*g + b) + f_shift
    #                      = xn*(g*f_scale) + (b*f_scale + f_shift)
    lns = []
    for l in range(NUM_LAYERS):
        fw, fb = params["film_w"][l], params["film_b"][l, 0]
        sc = temb @ fw[:D].T + fb[:D]                          # (B, D)
        sh = temb @ fw[D:].T + fb[D:]
        for g, b in ((params["ln1_g"][l, 0], params["ln1_b"][l, 0]),
                     (params["ln2_g"][l, 0], params["ln2_b"][l, 0])):
            lns.append(jnp.stack([g[None] * sc, b[None] * sc + sh], axis=1))
    for r in range(NUM_FF_RESID):
        fw, fb = params["rfilm_w"][r], params["rfilm_b"][r, 0]
        sc = temb @ fw[:D].T + fb[:D]
        sh = temb @ fw[D:].T + fb[D:]
        g, b = params["rln_g"][r, 0], params["rln_b"][r, 0]
        lns.append(jnp.stack([g[None] * sc, b[None] * sc + sh], axis=1))
    film = jnp.stack(lns, axis=1)                              # (B, NUM_LN, 2, D)
    return tok_col, pe, film


def pack_weights(p):
    """Pre-transpose to (in, out), fuse QKV, fold attention scale, pack biases."""
    D = D_MODEL
    att_scale = 1.0 / math.sqrt(HEAD_DIM)

    in_w_t = jnp.transpose(p["attn_in_w"], (0, 2, 1))          # (NL, D, 3D)
    wqkv = jnp.concatenate([in_w_t[:, :, :D] * att_scale, in_w_t[:, :, D:]], axis=-1)
    in_b = p["attn_in_b"]                                      # (NL, 3D)
    qkv_b = jnp.concatenate([in_b[:, :D] * att_scale, in_b[:, D:]], axis=-1)

    wo = jnp.transpose(p["attn_out_w"], (0, 2, 1))             # (NL, D, D)
    wff1 = jnp.concatenate([jnp.transpose(p["ff1_w"], (0, 2, 1)),
                            jnp.transpose(p["r1_w"], (0, 2, 1))], axis=0)  # (NLR, D, DFF)
    wff2 = jnp.concatenate([jnp.transpose(p["ff2_w"], (0, 2, 1)),
                            jnp.transpose(p["r2_w"], (0, 2, 1))], axis=0)  # (NLR, DFF, D)
    emb_w = p["emb_w"].T                                        # (S, D)
    out_w = p["out_w"].T                                        # (D, S)

    # pack every bias vector into one lane-dense (rows, 128) block
    bias = jnp.zeros((BIAS_ROWS, 128), jnp.float32)

    def put(rows, r, v):
        v = jnp.asarray(v, jnp.float32).reshape(-1)
        return rows.at[r, :v.shape[0]].set(v)

    bias = put(bias, ROW_EMB_B, p["emb_b"])
    bias = put(bias, ROW_OUT_B, p["out_b"])
    for l in range(NUM_LAYERS):
        a0 = ROW_ATT0 + 2 * l
        bias = put(bias, a0 + 0, qkv_b[l])
        bias = put(bias, a0 + 1, p["attn_out_b"][l])
    for j in range(NUM_LAYERS):
        f0 = ROW_FF0 + 2 * j
        bias = put(bias, f0 + 0, p["ff1_b"][j])
        bias = put(bias, f0 + 1, p["ff2_b"][j])
    for r in range(NUM_FF_RESID):
        f0 = ROW_FF0 + 2 * (NUM_LAYERS + r)
        bias = put(bias, f0 + 0, p["r1_b"][r])
        bias = put(bias, f0 + 1, p["r2_b"][r])

    return wqkv, wo, wff1, wff2, emb_w, out_w, bias


def sequence_transformer_forward(params, x_tokens, times, max_tb=256):
    """Pallas-backed forward: (B, D) int tokens, (B,) times -> (B, D, S) logits."""
    B, L = x_tokens.shape
    assert L == MAX_LEN
    tok_col, pe, film = _prepare_inputs(params, x_tokens, times)
    wqkv, wo, wff1, wff2, emb_w, out_w, bias = pack_weights(params)

    # Batch tiling: whole batch in one step when tiny; otherwise 8-row-aligned
    # tiles with >=2 grid steps so both v7x TensorCores get work ("parallel").
    # Single TC chips (v5e/v6e) just amortize per-step overhead over big tiles.
    if B <= 8:
        TB, Bp = B, B
    else:
        TB = min(max_tb, max(8, ((B + 1) // 2) // 8 * 8))
        Bp = pl.cdiv(B, TB) * TB
        if Bp != B:
            tok_col = jnp.pad(tok_col, ((0, (Bp - B) * L), (0, 0)))
            film = jnp.pad(film, ((0, Bp - B), (0, 0), (0, 0), (0, 0)))

    grid = (Bp // TB,)
    out = pl.pallas_call(
        transformer_kernel,
        out_shape=jax.ShapeDtypeStruct((Bp, L * S), jnp.float32),
        grid=grid,
        in_specs=[
            pl.BlockSpec((TB * L, 1), lambda b: (b, 0)),               # int32 tokens
            pl.BlockSpec((MAX_LEN, D_MODEL), lambda b: (0, 0)),        # pos-enc table
            pl.BlockSpec((TB, NUM_LN, 2, D_MODEL),
                         lambda b: (b, 0, 0, 0)),                      # fused LN*FiLM
            pl.BlockSpec(wqkv.shape, lambda b: (0, 0, 0)),
            pl.BlockSpec(wo.shape, lambda b: (0, 0, 0)),
            pl.BlockSpec(wff1.shape, lambda b: (0, 0, 0)),
            pl.BlockSpec(wff2.shape, lambda b: (0, 0, 0)),
            pl.BlockSpec(emb_w.shape, lambda b: (0, 0)),
            pl.BlockSpec(out_w.shape, lambda b: (0, 0)),
            pl.BlockSpec(bias.shape, lambda b: (0, 0)),
        ],
        out_specs=pl.BlockSpec((TB, L * S), lambda b: (b, 0)),         # lane-dense
        compiler_params=pltpu.CompilerParams(
            dimension_semantics=("parallel",),
            vmem_limit_bytes=48 * 1024 * 1024),
    )(tok_col, pe, film, wqkv, wo, wff1, wff2, emb_w, out_w, bias)

    return out[:B].reshape(B, L, S)


# ----- independent pure-JAX reference (mirrors the PyTorch module) -----------
def reference_forward(params, x_tokens, times):
    """Follows the torch module structure directly (separate LN / FiLM,
    per-head MHA with explicit 1/sqrt(hd) scale); independent of the kernel's
    weight packing and fusions, so it validates both packing and lowering."""
    D = D_MODEL
    x_tokens = x_tokens.astype(jnp.int32)
    times_i = times.astype(jnp.int32)
    one_hot = jax.nn.one_hot(x_tokens, S, dtype=jnp.float32)           # (B, L, S)

    t_emb = _timestep_embedding(
        (times_i * TIME_SCALE_FACTOR).astype(jnp.float32), TEMB_DIM)
    h = jnp.maximum(t_emb @ params["temb1_w"].T + params["temb1_b"], 0.0)
    temb = h @ params["temb2_w"].T + params["temb2_b"]                 # (B, 4*TEMB)

    def layer_norm(x, g, b):
        mu = jnp.mean(x, axis=-1, keepdims=True)
        var = jnp.mean((x - mu) ** 2, axis=-1, keepdims=True)
        return (x - mu) / jnp.sqrt(var + LN_EPS) * g + b

    def mha(x, in_w, in_b, out_w, out_b):
        qkv = x @ in_w.T + in_b
        q, k, v = qkv[..., :D], qkv[..., D:2 * D], qkv[..., 2 * D:]
        q = q / math.sqrt(HEAD_DIM)
        outs = []
        for hh in range(NUM_HEADS):
            sl = slice(hh * HEAD_DIM, (hh + 1) * HEAD_DIM)
            s = jnp.einsum('bqd,bkd->bqk', q[..., sl], k[..., sl])
            outs.append(jnp.einsum('bqk,bkd->bqd',
                                   jax.nn.softmax(s, axis=-1), v[..., sl]))
        return jnp.concatenate(outs, axis=-1) @ out_w.T + out_b

    x = one_hot @ params["emb_w"].T + params["emb_b"]                  # (B, L, D)
    x = x + _positional_encoding(MAX_LEN, D)[None]

    for l in range(NUM_LAYERS):
        film = temb @ params["film_w"][l].T + params["film_b"][l, 0]
        sc, sh = film[:, None, :D], film[:, None, D:]
        sa = mha(x, params["attn_in_w"][l], params["attn_in_b"][l],
                 params["attn_out_w"][l], params["attn_out_b"][l])
        x = layer_norm(x + sa, params["ln1_g"][l], params["ln1_b"][l])
        x = sc * x + sh
        ff = jnp.maximum(x @ params["ff1_w"][l].T + params["ff1_b"][l], 0.0)
        ff = ff @ params["ff2_w"][l].T + params["ff2_b"][l]
        x = layer_norm(x + ff, params["ln2_g"][l], params["ln2_b"][l])
        x = sc * x + sh

    for r in range(NUM_FF_RESID):
        film = temb @ params["rfilm_w"][r].T + params["rfilm_b"][r, 0]
        sc, sh = film[:, None, :D], film[:, None, D:]
        ff = jnp.maximum(x @ params["r1_w"][r].T + params["r1_b"][r], 0.0)
        ff = ff @ params["r2_w"][r].T + params["r2_b"][r]
        x = layer_norm(x + ff, params["rln_g"][r], params["rln_b"][r])
        x = sc * x + sh

    return x @ params["out_w"].T + params["out_b"] + one_hot           # (B, L, S)


# ----- deterministic parameter init (shapes follow the module __init__) ------
def init_params(key):
    ks = iter(jax.random.split(key, 40))

    def w(shape, scale=0.1):
        return scale * jax.random.normal(next(ks), shape, dtype=jnp.float32)

    NL, NR, D, DFF, TD4 = NUM_LAYERS, NUM_FF_RESID, D_MODEL, DIM_FF, 4 * TEMB_DIM
    p = {}
    p["emb_w"] = w((D, S))                      # input_embedding = Linear(S, d_model)
    p["emb_b"] = w((1, D))
    p["temb1_w"] = w((DFF, TEMB_DIM))           # temb_net: Linear, ReLU, Linear
    p["temb1_b"] = w((1, DFF))
    p["temb2_w"] = w((TD4, DFF))
    p["temb2_b"] = w((1, TD4))
    p["attn_in_w"] = w((NL, 3 * D, D))          # nn.MultiheadAttention in_proj
    p["attn_in_b"] = w((NL, 3 * D))
    p["attn_out_w"] = w((NL, D, D))             # out_proj
    p["attn_out_b"] = w((NL, 1, D))
    p["ln1_g"] = jnp.ones((NL, 1, D), jnp.float32)
    p["ln1_b"] = jnp.zeros((NL, 1, D), jnp.float32)
    p["ln2_g"] = jnp.ones((NL, 1, D), jnp.float32)
    p["ln2_b"] = jnp.zeros((NL, 1, D), jnp.float32)
    p["ff1_w"] = w((NL, DFF, D))
    p["ff1_b"] = w((NL, 1, DFF))
    p["ff2_w"] = w((NL, D, DFF))
    p["ff2_b"] = w((NL, 1, D))
    film_base = jnp.concatenate(
        [jnp.ones((D,), jnp.float32), jnp.zeros((D,), jnp.float32)])
    p["film_w"] = w((NL, 2 * D, TD4), 0.02)     # film_from_temb = Linear(4*temb, 2*d)
    p["film_b"] = film_base[None, None, :] + w((NL, 1, 2 * D), 0.02)
    p["r1_w"] = w((NR, DFF, D))                 # FFResidual blocks
    p["r1_b"] = w((NR, 1, DFF))
    p["r2_w"] = w((NR, D, DFF))
    p["r2_b"] = w((NR, 1, D))
    p["rln_g"] = jnp.ones((NR, 1, D), jnp.float32)
    p["rln_b"] = jnp.zeros((NR, 1, D), jnp.float32)
    p["rfilm_w"] = w((NR, 2 * D, TD4), 0.02)
    p["rfilm_b"] = film_base[None, None, :] + w((NR, 1, 2 * D), 0.02)
    p["out_w"] = w((S, D))                      # output_linear = Linear(d_model, S)
    p["out_b"] = w((1, S))
    return p


if __name__ == "__main__":
    key = jax.random.PRNGKey(0)
    pkey, xkey, tkey = jax.random.split(key, 3)
    params = init_params(pkey)

    B = 2
    x_tokens = jax.random.randint(xkey, (B, MAX_LEN), 0, S)           # (B, D) tokens
    times = jax.random.randint(tkey, (B,), 0, 4).astype(jnp.float32)  # (B,)

    logits = jax.block_until_ready(
        sequence_transformer_forward(params, x_tokens, times))
    assert logits.shape == (B, MAX_LEN, S), logits.shape
    assert logits.dtype == jnp.float32

    ref = jax.block_until_ready(reference_forward(params, x_tokens, times))
    max_err = float(jnp.max(jnp.abs(logits - ref)))
    # 2e-3 tolerance covers the approx-reciprocal softmax normalization (~1e-4 rel).
    assert jnp.allclose(logits, ref, atol=2e-3, rtol=2e-3), max_err

    print("KERNEL_OK")
</pallas_src>

<mosaic_0001>
module attributes {stable_mosaic.version = 11 : i64} {
  func.func @transformer_kernel(%arg0: i32, %arg1: memref<16x1xi32, #tpu.memory_space<vmem>>, %arg2: memref<8x32xf32, #tpu.memory_space<vmem>>, %arg3: memref<2x5x2x32xf32, #tpu.memory_space<vmem>>, %arg4: memref<2x32x96xf32, #tpu.memory_space<vmem>>, %arg5: memref<2x32x32xf32, #tpu.memory_space<vmem>>, %arg6: memref<3x32x64xf32, #tpu.memory_space<vmem>>, %arg7: memref<3x64x32xf32, #tpu.memory_space<vmem>>, %arg8: memref<16x32xf32, #tpu.memory_space<vmem>>, %arg9: memref<32x16xf32, #tpu.memory_space<vmem>>, %arg10: memref<16x128xf32, #tpu.memory_space<vmem>>, %arg11: memref<2x128xf32, #tpu.memory_space<vmem>>) attributes {dimension_semantics = [#tpu.dimension_semantics<parallel>], iteration_bounds = array<i64: 1>, scalar_prefetch = 0 : i64, scratch_operands = 0 : i64, tpu.core_type = #tpu.core_type<tc>, window_params = [{transform_indices = @transform_0, window_bounds = array<i64: 16, 1>}, {pipeline_mode = #tpu.pipeline_mode<synchronous>, transform_indices = @transform_1, window_bounds = array<i64: 8, 32>}, {transform_indices = @transform_2, window_bounds = array<i64: 2, 5, 2, 32>}, {pipeline_mode = #tpu.pipeline_mode<synchronous>, transform_indices = @transform_3, window_bounds = array<i64: 2, 32, 96>}, {pipeline_mode = #tpu.pipeline_mode<synchronous>, transform_indices = @transform_4, window_bounds = array<i64: 2, 32, 32>}, {pipeline_mode = #tpu.pipeline_mode<synchronous>, transform_indices = @transform_5, window_bounds = array<i64: 3, 32, 64>}, {pipeline_mode = #tpu.pipeline_mode<synchronous>, transform_indices = @transform_6, window_bounds = array<i64: 3, 64, 32>}, {pipeline_mode = #tpu.pipeline_mode<synchronous>, transform_indices = @transform_7, window_bounds = array<i64: 16, 32>}, {pipeline_mode = #tpu.pipeline_mode<synchronous>, transform_indices = @transform_8, window_bounds = array<i64: 32, 16>}, {pipeline_mode = #tpu.pipeline_mode<synchronous>, transform_indices = @transform_9, window_bounds = array<i64: 16, 128>}, {transform_indices = @transform_10, window_bounds = array<i64: 2, 128>}]} {
    %c0 = arith.constant 0 : index
    %c0_0 = arith.constant 0 : index
    %0 = vector.load %arg1[%c0, %c0_0] : memref<16x1xi32, #tpu.memory_space<vmem>>, vector<16x1xi32>
    %c0_1 = arith.constant 0 : index
    %c0_2 = arith.constant 0 : index
    %1 = vector.load %arg2[%c0_1, %c0_2] : memref<8x32xf32, #tpu.memory_space<vmem>>, vector<8x32xf32>
    %c0_3 = arith.constant 0 : index
    %c0_4 = arith.constant 0 : index
    %c0_5 = arith.constant 0 : index
    %c0_6 = arith.constant 0 : index
    %2 = vector.load %arg3[%c0_3, %c0_4, %c0_5, %c0_6] : memref<2x5x2x32xf32, #tpu.memory_space<vmem>>, vector<2x5x2x32xf32>
    %3 = tpu.iota {dimensions = array<i32: 1>} : vector<16x16xi32>
    %4 = vector.broadcast %0 : vector<16x1xi32> to vector<16x16xi32>
    %5 = arith.cmpi eq, %3, %4 : vector<16x16xi32>
    %6 = arith.extui %5 : vector<16x16xi1> to vector<16x16xi32>
    %7 = arith.sitofp %6 : vector<16x16xi32> to vector<16x16xf32>
    %c0_7 = arith.constant 0 : index
    %c0_8 = arith.constant 0 : index
    %8 = vector.load %arg8[%c0_7, %c0_8] : memref<16x32xf32, #tpu.memory_space<vmem>>, vector<16x32xf32>
    %cst = arith.constant dense<0.000000e+00> : vector<16x32xf32>
    %9 = tpu.matmul %7, %8, %cst {dimension_numbers = #tpu.dot_dimension_numbers<[1], [0], [0], [1], [0, 0, 1, 1], [], []>} : vector<16x16xf32>, vector<16x32xf32>, vector<16x32xf32> -> vector<16x32xf32>
    %c0_9 = arith.constant 0 : index
    %c0_10 = arith.constant 0 : index
    %10 = vector.load %arg10[%c0_9, %c0_10] : memref<16x128xf32, #tpu.memory_space<vmem>>, vector<1x32xf32>
    %11 = vector.broadcast %10 : vector<1x32xf32> to vector<16x32xf32>
    %12 = arith.addf %9, %11 : vector<16x32xf32>
    %13 = vector.shape_cast %12 : vector<16x32xf32> to vector<2x8x32xf32>
    %14 = vector.shape_cast %1 : vector<8x32xf32> to vector<1x8x32xf32>
    %15 = vector.broadcast %14 : vector<1x8x32xf32> to vector<2x8x32xf32>
    %16 = arith.addf %13, %15 : vector<2x8x32xf32>
    %17 = vector.shape_cast %16 : vector<2x8x32xf32> to vector<16x32xf32>
    %c0_11 = arith.constant 0 : index
    %c0_12 = arith.constant 0 : index
    %c0_13 = arith.constant 0 : index
    %18 = vector.load %arg4[%c0_11, %c0_12, %c0_13] : memref<2x32x96xf32, #tpu.memory_space<vmem>>, vector<1x32x96xf32>
    %19 = vector.shape_cast %18 : vector<1x32x96xf32> to vector<32x96xf32>
    %cst_14 = arith.constant dense<0.000000e+00> : vector<16x96xf32>
    %20 = tpu.matmul %17, %19, %cst_14 {dimension_numbers = #tpu.dot_dimension_numbers<[1], [0], [0], [1], [0, 0, 1, 1], [], []>} : vector<16x32xf32>, vector<32x96xf32>, vector<16x96xf32> -> vector<16x96xf32>
    %c2 = arith.constant 2 : index
    %c0_15 = arith.constant 0 : index
    %21 = vector.load %arg10[%c2, %c0_15] : memref<16x128xf32, #tpu.memory_space<vmem>>, vector<1x96xf32>
    %22 = vector.broadcast %21 : vector<1x96xf32> to vector<16x96xf32>
    %23 = arith.addf %20, %22 : vector<16x96xf32>
    %24 = vector.extract_strided_slice %23 {offsets = [0, 0], sizes = [16, 32], strides = [1, 1]} : vector<16x96xf32> to vector<16x32xf32>
    %25 = vector.shape_cast %24 : vector<16x32xf32> to vector<2x8x32xf32>
    %26 = vector.extract_strided_slice %23 {offsets = [0, 32], sizes = [16, 32], strides = [1, 1]} : vector<16x96xf32> to vector<16x32xf32>
    %27 = vector.shape_cast %26 : vector<16x32xf32> to vector<2x8x32xf32>
    %28 = vector.extract_strided_slice %23 {offsets = [0, 64], sizes = [16, 32], strides = [1, 1]} : vector<16x96xf32> to vector<16x32xf32>
    %29 = vector.shape_cast %28 : vector<16x32xf32> to vector<2x8x32xf32>
    %30 = vector.extract_strided_slice %25 {offsets = [0, 0, 0], sizes = [2, 8, 16], strides = [1, 1, 1]} : vector<2x8x32xf32> to vector<2x8x16xf32>
    %31 = vector.extract_strided_slice %27 {offsets = [0, 0, 0], sizes = [2, 8, 16], strides = [1, 1, 1]} : vector<2x8x32xf32> to vector<2x8x16xf32>
    "tpu.trace_start"() <{level = 10 : i32, message = "bqd,bkd->bqk"}> : () -> ()
    %cst_16 = arith.constant dense<0.000000e+00> : vector<2x8x8xf32>
    %32 = tpu.matmul %30, %31, %cst_16 {dimension_numbers = #tpu.dot_dimension_numbers<[2], [2], [1], [1], [0, 0, 0, 1, 1, 1], [0], [0]>} : vector<2x8x16xf32>, vector<2x8x16xf32>, vector<2x8x8xf32> -> vector<2x8x8xf32>
    "tpu.trace_stop"() : () -> ()
    %33 = vector.extract_strided_slice %25 {offsets = [0, 0, 16], sizes = [2, 8, 16], strides = [1, 1, 1]} : vector<2x8x32xf32> to vector<2x8x16xf32>
    %34 = vector.extract_strided_slice %27 {offsets = [0, 0, 16], sizes = [2, 8, 16], strides = [1, 1, 1]} : vector<2x8x32xf32> to vector<2x8x16xf32>
    "tpu.trace_start"() <{level = 10 : i32, message = "bqd,bkd->bqk"}> : () -> ()
    %cst_17 = arith.constant dense<0.000000e+00> : vector<2x8x8xf32>
    %35 = tpu.matmul %33, %34, %cst_17 {dimension_numbers = #tpu.dot_dimension_numbers<[2], [2], [1], [1], [0, 0, 0, 1, 1, 1], [0], [0]>} : vector<2x8x16xf32>, vector<2x8x16xf32>, vector<2x8x8xf32> -> vector<2x8x8xf32>
    "tpu.trace_stop"() : () -> ()
    %36 = tpu.concatenate %32, %35 in 0 : vector<2x8x8xf32>, vector<2x8x8xf32> -> vector<4x8x8xf32>
    %37 = vector.extract_strided_slice %29 {offsets = [0, 0, 0], sizes = [2, 8, 16], strides = [1, 1, 1]} : vector<2x8x32xf32> to vector<2x8x16xf32>
    %38 = vector.extract_strided_slice %29 {offsets = [0, 0, 16], sizes = [2, 8, 16], strides = [1, 1, 1]} : vector<2x8x32xf32> to vector<2x8x16xf32>
    %39 = tpu.concatenate %37, %38 in 0 : vector<2x8x16xf32>, vector<2x8x16xf32> -> vector<4x8x16xf32>
    %cst_18 = arith.constant dense<0xFF800000> : vector<4x8xf32>
    %40 = vector.multi_reduction <maximumf>, %36, %cst_18 [2] : vector<4x8x8xf32> to vector<4x8xf32>
    %41 = vector.shape_cast %40 : vector<4x8xf32> to vector<4x8x1xf32>
    %42 = vector.broadcast %41 : vector<4x8x1xf32> to vector<4x8x8xf32>
    %43 = arith.subf %36, %42 : vector<4x8x8xf32>
    %44 = math.exp %43 : vector<4x8x8xf32>
    %cst_19 = arith.constant dense<0.000000e+00> : vector<4x8xf32>
    %45 = vector.multi_reduction <add>, %44, %cst_19 [2] : vector<4x8x8xf32> to vector<4x8xf32>
    %46 = vector.shape_cast %45 : vector<4x8xf32> to vector<4x8x1xf32>
    %47 = tpu.reciprocal %46 {approx = true} : vector<4x8x1xf32> -> vector<4x8x1xf32>
    %48 = vector.broadcast %47 : vector<4x8x1xf32> to vector<4x8x8xf32>
    %49 = arith.mulf %44, %48 : vector<4x8x8xf32>
    "tpu.trace_start"() <{level = 10 : i32, message = "bqk,bkd->bqd"}> : () -> ()
    %cst_20 = arith.constant dense<0.000000e+00> : vector<4x8x16xf32>
    %50 = tpu.matmul %49, %39, %cst_20 {dimension_numbers = #tpu.dot_dimension_numbers<[2], [1], [1], [2], [0, 0, 0, 1, 1, 2], [0], [0]>} : vector<4x8x8xf32>, vector<4x8x16xf32>, vector<4x8x16xf32> -> vector<4x8x16xf32>
    "tpu.trace_stop"() : () -> ()
    %51 = vector.extract_strided_slice %50 {offsets = [0, 0, 0], sizes = [2, 8, 16], strides = [1, 1, 1]} : vector<4x8x16xf32> to vector<2x8x16xf32>
    %52 = vector.extract_strided_slice %50 {offsets = [2, 0, 0], sizes = [2, 8, 16], strides = [1, 1, 1]} : vector<4x8x16xf32> to vector<2x8x16xf32>
    %53 = tpu.concatenate %51, %52 in 2 : vector<2x8x16xf32>, vector<2x8x16xf32> -> vector<2x8x32xf32>
    %54 = vector.shape_cast %53 : vector<2x8x32xf32> to vector<16x32xf32>
    %c0_21 = arith.constant 0 : index
    %c0_22 = arith.constant 0 : index
    %c0_23 = arith.constant 0 : index
    %55 = vector.load %arg5[%c0_21, %c0_22, %c0_23] : memref<2x32x32xf32, #tpu.memory_space<vmem>>, vector<1x32x32xf32>
    %56 = vector.shape_cast %55 : vector<1x32x32xf32> to vector<32x32xf32>
    %cst_24 = arith.constant dense<0.000000e+00> : vector<16x32xf32>
    %57 = tpu.matmul %54, %56, %cst_24 {dimension_numbers = #tpu.dot_dimension_numbers<[1], [0], [0], [1], [0, 0, 1, 1], [], []>} : vector<16x32xf32>, vector<32x32xf32>, vector<16x32xf32> -> vector<16x32xf32>
    %c3 = arith.constant 3 : index
    %c0_25 = arith.constant 0 : index
    %58 = vector.load %arg10[%c3, %c0_25] : memref<16x128xf32, #tpu.memory_space<vmem>>, vector<1x32xf32>
    %59 = vector.broadcast %58 : vector<1x32xf32> to vector<16x32xf32>
    %60 = arith.addf %57, %59 : vector<16x32xf32>
    %61 = arith.addf %17, %60 : vector<16x32xf32>
    %62 = vector.shape_cast %61 : vector<16x32xf32> to vector<2x8x32xf32>
    %cst_26 = arith.constant dense<0.000000e+00> : vector<2x8xf32>
    %63 = vector.multi_reduction <add>, %62, %cst_26 [2] : vector<2x8x32xf32> to vector<2x8xf32>
    %64 = vector.shape_cast %63 : vector<2x8xf32> to vector<2x8x1xf32>
    %cst_27 = arith.constant 3.200000e+01 : f32
    %65 = vector.broadcast %cst_27 : f32 to vector<2x8x1xf32>
    %66 = arith.divf %64, %65 : vector<2x8x1xf32>
    %67 = vector.broadcast %66 : vector<2x8x1xf32> to vector<2x8x32xf32>
    %68 = arith.subf %62, %67 : vector<2x8x32xf32>
    %69 = arith.mulf %68, %68 : vector<2x8x32xf32>
    %cst_28 = arith.constant dense<0.000000e+00> : vector<2x8xf32>
    %70 = vector.multi_reduction <add>, %69, %cst_28 [2] : vector<2x8x32xf32> to vector<2x8xf32>
    %71 = vector.shape_cast %70 : vector<2x8xf32> to vector<2x8x1xf32>
    %cst_29 = arith.constant 3.200000e+01 : f32
    %72 = vector.broadcast %cst_29 : f32 to vector<2x8x1xf32>
    %73 = arith.divf %71, %72 : vector<2x8x1xf32>
    %cst_30 = arith.constant 9.99999974E-6 : f32
    %74 = vector.broadcast %cst_30 : f32 to vector<2x8x1xf32>
    %75 = arith.addf %73, %74 : vector<2x8x1xf32>
    %76 = math.rsqrt %75 : vector<2x8x1xf32>
    %77 = vector.broadcast %76 : vector<2x8x1xf32> to vector<2x8x32xf32>
    %78 = arith.mulf %68, %77 : vector<2x8x32xf32>
    %79 = vector.extract_strided_slice %2 {offsets = [0, 0, 0, 0], sizes = [2, 1, 1, 32], strides = [1, 1, 1, 1]} : vector<2x5x2x32xf32> to vector<2x1x1x32xf32>
    %80 = vector.shape_cast %79 : vector<2x1x1x32xf32> to vector<2x32xf32>
    %81 = vector.shape_cast %80 : vector<2x32xf32> to vector<2x1x32xf32>
    %82 = vector.extract_strided_slice %2 {offsets = [0, 0, 1, 0], sizes = [2, 1, 1, 32], strides = [1, 1, 1, 1]} : vector<2x5x2x32xf32> to vector<2x1x1x32xf32>
    %83 = vector.shape_cast %82 : vector<2x1x1x32xf32> to vector<2x32xf32>
    %84 = vector.shape_cast %83 : vector<2x32xf32> to vector<2x1x32xf32>
    %85 = vector.broadcast %81 : vector<2x1x32xf32> to vector<2x8x32xf32>
    %86 = arith.mulf %78, %85 : vector<2x8x32xf32>
    %87 = vector.broadcast %84 : vector<2x1x32xf32> to vector<2x8x32xf32>
    %88 = arith.addf %86, %87 : vector<2x8x32xf32>
    %89 = vector.shape_cast %88 : vector<2x8x32xf32> to vector<16x32xf32>
    %c0_31 = arith.constant 0 : index
    %c0_32 = arith.constant 0 : index
    %c0_33 = arith.constant 0 : index
    %90 = vector.load %arg6[%c0_31, %c0_32, %c0_33] : memref<3x32x64xf32, #tpu.memory_space<vmem>>, vector<1x32x64xf32>
    %91 = vector.shape_cast %90 : vector<1x32x64xf32> to vector<32x64xf32>
    %cst_34 = arith.constant dense<0.000000e+00> : vector<16x64xf32>
    %92 = tpu.matmul %89, %91, %cst_34 {dimension_numbers = #tpu.dot_dimension_numbers<[1], [0], [0], [1], [0, 0, 1, 1], [], []>} : vector<16x32xf32>, vector<32x64xf32>, vector<16x64xf32> -> vector<16x64xf32>
    %c6 = arith.constant 6 : index
    %c0_35 = arith.constant 0 : index
    %93 = vector.load %arg10[%c6, %c0_35] : memref<16x128xf32, #tpu.memory_space<vmem>>, vector<1x64xf32>
    %94 = vector.broadcast %93 : vector<1x64xf32> to vector<16x64xf32>
    %95 = arith.addf %92, %94 : vector<16x64xf32>
    %cst_36 = arith.constant 0.000000e+00 : f32
    %96 = vector.broadcast %cst_36 : f32 to vector<16x64xf32>
    %97 = arith.maximumf %95, %96 : vector<16x64xf32>
    %c0_37 = arith.constant 0 : index
    %c0_38 = arith.constant 0 : index
    %c0_39 = arith.constant 0 : index
    %98 = vector.load %arg7[%c0_37, %c0_38, %c0_39] : memref<3x64x32xf32, #tpu.memory_space<vmem>>, vector<1x64x32xf32>
    %99 = vector.shape_cast %98 : vector<1x64x32xf32> to vector<64x32xf32>
    %cst_40 = arith.constant dense<0.000000e+00> : vector<16x32xf32>
    %100 = tpu.matmul %97, %99, %cst_40 {dimension_numbers = #tpu.dot_dimension_numbers<[1], [0], [0], [1], [0, 0, 1, 1], [], []>} : vector<16x64xf32>, vector<64x32xf32>, vector<16x32xf32> -> vector<16x32xf32>
    %c7 = arith.constant 7 : index
    %c0_41 = arith.constant 0 : index
    %101 = vector.load %arg10[%c7, %c0_41] : memref<16x128xf32, #tpu.memory_space<vmem>>, vector<1x32xf32>
    %102 = vector.broadcast %101 : vector<1x32xf32> to vector<16x32xf32>
    %103 = arith.addf %100, %102 : vector<16x32xf32>
    %104 = arith.addf %89, %103 : vector<16x32xf32>
    %105 = vector.shape_cast %104 : vector<16x32xf32> to vector<2x8x32xf32>
    %cst_42 = arith.constant dense<0.000000e+00> : vector<2x8xf32>
    %106 = vector.multi_reduction <add>, %105, %cst_42 [2] : vector<2x8x32xf32> to vector<2x8xf32>
    %107 = vector.shape_cast %106 : vector<2x8xf32> to vector<2x8x1xf32>
    %cst_43 = arith.constant 3.200000e+01 : f32
    %108 = vector.broadcast %cst_43 : f32 to vector<2x8x1xf32>
    %109 = arith.divf %107, %108 : vector<2x8x1xf32>
    %110 = vector.broadcast %109 : vector<2x8x1xf32> to vector<2x8x32xf32>
    %111 = arith.subf %105, %110 : vector<2x8x32xf32>
    %112 = arith.mulf %111, %111 : vector<2x8x32xf32>
    %cst_44 = arith.constant dense<0.000000e+00> : vector<2x8xf32>
    %113 = vector.multi_reduction <add>, %112, %cst_44 [2] : vector<2x8x32xf32> to vector<2x8xf32>
    %114 = vector.shape_cast %113 : vector<2x8xf32> to vector<2x8x1xf32>
    %cst_45 = arith.constant 3.200000e+01 : f32
    %115 = vector.broadcast %cst_45 : f32 to vector<2x8x1xf32>
    %116 = arith.divf %114, %115 : vector<2x8x1xf32>
    %cst_46 = arith.constant 9.99999974E-6 : f32
    %117 = vector.broadcast %cst_46 : f32 to vector<2x8x1xf32>
    %118 = arith.addf %116, %117 : vector<2x8x1xf32>
    %119 = math.rsqrt %118 : vector<2x8x1xf32>
    %120 = vector.broadcast %119 : vector<2x8x1xf32> to vector<2x8x32xf32>
    %121 = arith.mulf %111, %120 : vector<2x8x32xf32>
    %122 = vector.extract_strided_slice %2 {offsets = [0, 1, 0, 0], sizes = [2, 1, 1, 32], strides = [1, 1, 1, 1]} : vector<2x5x2x32xf32> to vector<2x1x1x32xf32>
    %123 = vector.shape_cast %122 : vector<2x1x1x32xf32> to vector<2x32xf32>
    %124 = vector.shape_cast %123 : vector<2x32xf32> to vector<2x1x32xf32>
    %125 = vector.extract_strided_slice %2 {offsets = [0, 1, 1, 0], sizes = [2, 1, 1, 32], strides = [1, 1, 1, 1]} : vector<2x5x2x32xf32> to vector<2x1x1x32xf32>
    %126 = vector.shape_cast %125 : vector<2x1x1x32xf32> to vector<2x32xf32>
    %127 = vector.shape_cast %126 : vector<2x32xf32> to vector<2x1x32xf32>
    %128 = vector.broadcast %124 : vector<2x1x32xf32> to vector<2x8x32xf32>
    %129 = arith.mulf %121, %128 : vector<2x8x32xf32>
    %130 = vector.broadcast %127 : vector<2x1x32xf32> to vector<2x8x32xf32>
    %131 = arith.addf %129, %130 : vector<2x8x32xf32>
    %132 = vector.shape_cast %131 : vector<2x8x32xf32> to vector<16x32xf32>
    %c1 = arith.constant 1 : index
    %c0_47 = arith.constant 0 : index
    %c0_48 = arith.constant 0 : index
    %133 = vector.load %arg4[%c1, %c0_47, %c0_48] : memref<2x32x96xf32, #tpu.memory_space<vmem>>, vector<1x32x96xf32>
    %134 = vector.shape_cast %133 : vector<1x32x96xf32> to vector<32x96xf32>
    %cst_49 = arith.constant dense<0.000000e+00> : vector<16x96xf32>
    %135 = tpu.matmul %132, %134, %cst_49 {dimension_numbers = #tpu.dot_dimension_numbers<[1], [0], [0], [1], [0, 0, 1, 1], [], []>} : vector<16x32xf32>, vector<32x96xf32>, vector<16x96xf32> -> vector<16x96xf32>
    %c4 = arith.constant 4 : index
    %c0_50 = arith.constant 0 : index
    %136 = vector.load %arg10[%c4, %c0_50] : memref<16x128xf32, #tpu.memory_space<vmem>>, vector<1x96xf32>
    %137 = vector.broadcast %136 : vector<1x96xf32> to vector<16x96xf32>
    %138 = arith.addf %135, %137 : vector<16x96xf32>
    %139 = vector.extract_strided_slice %138 {offsets = [0, 0], sizes = [16, 32], strides = [1, 1]} : vector<16x96xf32> to vector<16x32xf32>
    %140 = vector.shape_cast %139 : vector<16x32xf32> to vector<2x8x32xf32>
    %141 = vector.extract_strided_slice %138 {offsets = [0, 32], sizes = [16, 32], strides = [1, 1]} : vector<16x96xf32> to vector<16x32xf32>
    %142 = vector.shape_cast %141 : vector<16x32xf32> to vector<2x8x32xf32>
    %143 = vector.extract_strided_slice %138 {offsets = [0, 64], sizes = [16, 32], strides = [1, 1]} : vector<16x96xf32> to vector<16x32xf32>
    %144 = vector.shape_cast %143 : vector<16x32xf32> to vector<2x8x32xf32>
    %145 = vector.extract_strided_slice %140 {offsets = [0, 0, 0], sizes = [2, 8, 16], strides = [1, 1, 1]} : vector<2x8x32xf32> to vector<2x8x16xf32>
    %146 = vector.extract_strided_slice %142 {offsets = [0, 0, 0], sizes = [2, 8, 16], strides = [1, 1, 1]} : vector<2x8x32xf32> to vector<2x8x16xf32>
    "tpu.trace_start"() <{level = 10 : i32, message = "bqd,bkd->bqk"}> : () -> ()
    %cst_51 = arith.constant dense<0.000000e+00> : vector<2x8x8xf32>
    %147 = tpu.matmul %145, %146, %cst_51 {dimension_numbers = #tpu.dot_dimension_numbers<[2], [2], [1], [1], [0, 0, 0, 1, 1, 1], [0], [0]>} : vector<2x8x16xf32>, vector<2x8x16xf32>, vector<2x8x8xf32> -> vector<2x8x8xf32>
    "tpu.trace_stop"() : () -> ()
    %148 = vector.extract_strided_slice %140 {offsets = [0, 0, 16], sizes = [2, 8, 16], strides = [1, 1, 1]} : vector<2x8x32xf32> to vector<2x8x16xf32>
    %149 = vector.extract_strided_slice %142 {offsets = [0, 0, 16], sizes = [2, 8, 16], strides = [1, 1, 1]} : vector<2x8x32xf32> to vector<2x8x16xf32>
    "tpu.trace_start"() <{level = 10 : i32, message = "bqd,bkd->bqk"}> : () -> ()
    %cst_52 = arith.constant dense<0.000000e+00> : vector<2x8x8xf32>
    %150 = tpu.matmul %148, %149, %cst_52 {dimension_numbers = #tpu.dot_dimension_numbers<[2], [2], [1], [1], [0, 0, 0, 1, 1, 1], [0], [0]>} : vector<2x8x16xf32>, vector<2x8x16xf32>, vector<2x8x8xf32> -> vector<2x8x8xf32>
    "tpu.trace_stop"() : () -> ()
    %151 = tpu.concatenate %147, %150 in 0 : vector<2x8x8xf32>, vector<2x8x8xf32> -> vector<4x8x8xf32>
    %152 = vector.extract_strided_slice %144 {offsets = [0, 0, 0], sizes = [2, 8, 16], strides = [1, 1, 1]} : vector<2x8x32xf32> to vector<2x8x16xf32>
    %153 = vector.extract_strided_slice %144 {offsets = [0, 0, 16], sizes = [2, 8, 16], strides = [1, 1, 1]} : vector<2x8x32xf32> to vector<2x8x16xf32>
    %154 = tpu.concatenate %152, %153 in 0 : vector<2x8x16xf32>, vector<2x8x16xf32> -> vector<4x8x16xf32>
    %cst_53 = arith.constant dense<0xFF800000> : vector<4x8xf32>
    %155 = vector.multi_reduction <maximumf>, %151, %cst_53 [2] : vector<4x8x8xf32> to vector<4x8xf32>
    %156 = vector.shape_cast %155 : vector<4x8xf32> to vector<4x8x1xf32>
    %157 = vector.broadcast %156 : vector<4x8x1xf32> to vector<4x8x8xf32>
    %158 = arith.subf %151, %157 : vector<4x8x8xf32>
    %159 = math.exp %158 : vector<4x8x8xf32>
    %cst_54 = arith.constant dense<0.000000e+00> : vector<4x8xf32>
    %160 = vector.multi_reduction <add>, %159, %cst_54 [2] : vector<4x8x8xf32> to vector<4x8xf32>
    %161 = vector.shape_cast %160 : vector<4x8xf32> to vector<4x8x1xf32>
    %162 = tpu.reciprocal %161 {approx = true} : vector<4x8x1xf32> -> vector<4x8x1xf32>
    %163 = vector.broadcast %162 : vector<4x8x1xf32> to vector<4x8x8xf32>
    %164 = arith.mulf %159, %163 : vector<4x8x8xf32>
    "tpu.trace_start"() <{level = 10 : i32, message = "bqk,bkd->bqd"}> : () -> ()
    %cst_55 = arith.constant dense<0.000000e+00> : vector<4x8x16xf32>
    %165 = tpu.matmul %164, %154, %cst_55 {dimension_numbers = #tpu.dot_dimension_numbers<[2], [1], [1], [2], [0, 0, 0, 1, 1, 2], [0], [0]>} : vector<4x8x8xf32>, vector<4x8x16xf32>, vector<4x8x16xf32> -> vector<4x8x16xf32>
    "tpu.trace_stop"() : () -> ()
    %166 = vector.extract_strided_slice %165 {offsets = [0, 0, 0], sizes = [2, 8, 16], strides = [1, 1, 1]} : vector<4x8x16xf32> to vector<2x8x16xf32>
    %167 = vector.extract_strided_slice %165 {offsets = [2, 0, 0], sizes = [2, 8, 16], strides = [1, 1, 1]} : vector<4x8x16xf32> to vector<2x8x16xf32>
    %168 = tpu.concatenate %166, %167 in 2 : vector<2x8x16xf32>, vector<2x8x16xf32> -> vector<2x8x32xf32>
    %169 = vector.shape_cast %168 : vector<2x8x32xf32> to vector<16x32xf32>
    %c1_56 = arith.constant 1 : index
    %c0_57 = arith.constant 0 : index
    %c0_58 = arith.constant 0 : index
    %170 = vector.load %arg5[%c1_56, %c0_57, %c0_58] : memref<2x32x32xf32, #tpu.memory_space<vmem>>, vector<1x32x32xf32>
    %171 = vector.shape_cast %170 : vector<1x32x32xf32> to vector<32x32xf32>
    %cst_59 = arith.constant dense<0.000000e+00> : vector<16x32xf32>
    %172 = tpu.matmul %169, %171, %cst_59 {dimension_numbers = #tpu.dot_dimension_numbers<[1], [0], [0], [1], [0, 0, 1, 1], [], []>} : vector<16x32xf32>, vector<32x32xf32>, vector<16x32xf32> -> vector<16x32xf32>
    %c5 = arith.constant 5 : index
    %c0_60 = arith.constant 0 : index
    %173 = vector.load %arg10[%c5, %c0_60] : memref<16x128xf32, #tpu.memory_space<vmem>>, vector<1x32xf32>
    %174 = vector.broadcast %173 : vector<1x32xf32> to vector<16x32xf32>
    %175 = arith.addf %172, %174 : vector<16x32xf32>
    %176 = arith.addf %132, %175 : vector<16x32xf32>
    %177 = vector.shape_cast %176 : vector<16x32xf32> to vector<2x8x32xf32>
    %cst_61 = arith.constant dense<0.000000e+00> : vector<2x8xf32>
    %178 = vector.multi_reduction <add>, %177, %cst_61 [2] : vector<2x8x32xf32> to vector<2x8xf32>
    %179 = vector.shape_cast %178 : vector<2x8xf32> to vector<2x8x1xf32>
    %cst_62 = arith.constant 3.200000e+01 : f32
    %180 = vector.broadcast %cst_62 : f32 to vector<2x8x1xf32>
    %181 = arith.divf %179, %180 : vector<2x8x1xf32>
    %182 = vector.broadcast %181 : vector<2x8x1xf32> to vector<2x8x32xf32>
    %183 = arith.subf %177, %182 : vector<2x8x32xf32>
    %184 = arith.mulf %183, %183 : vector<2x8x32xf32>
    %cst_63 = arith.constant dense<0.000000e+00> : vector<2x8xf32>
    %185 = vector.multi_reduction <add>, %184, %cst_63 [2] : vector<2x8x32xf32> to vector<2x8xf32>
    %186 = vector.shape_cast %185 : vector<2x8xf32> to vector<2x8x1xf32>
    %cst_64 = arith.constant 3.200000e+01 : f32
    %187 = vector.broadcast %cst_64 : f32 to vector<2x8x1xf32>
    %188 = arith.divf %186, %187 : vector<2x8x1xf32>
    %cst_65 = arith.constant 9.99999974E-6 : f32
    %189 = vector.broadcast %cst_65 : f32 to vector<2x8x1xf32>
    %190 = arith.addf %188, %189 : vector<2x8x1xf32>
    %191 = math.rsqrt %190 : vector<2x8x1xf32>
    %192 = vector.broadcast %191 : vector<2x8x1xf32> to vector<2x8x32xf32>
    %193 = arith.mulf %183, %192 : vector<2x8x32xf32>
    %194 = vector.extract_strided_slice %2 {offsets = [0, 2, 0, 0], sizes = [2, 1, 1, 32], strides = [1, 1, 1, 1]} : vector<2x5x2x32xf32> to vector<2x1x1x32xf32>
    %195 = vector.shape_cast %194 : vector<2x1x1x32xf32> to vector<2x32xf32>
    %196 = vector.shape_cast %195 : vector<2x32xf32> to vector<2x1x32xf32>
    %197 = vector.extract_strided_slice %2 {offsets = [0, 2, 1, 0], sizes = [2, 1, 1, 32], strides = [1, 1, 1, 1]} : vector<2x5x2x32xf32> to vector<2x1x1x32xf32>
    %198 = vector.shape_cast %197 : vector<2x1x1x32xf32> to vector<2x32xf32>
    %199 = vector.shape_cast %198 : vector<2x32xf32> to vector<2x1x32xf32>
    %200 = vector.broadcast %196 : vector<2x1x32xf32> to vector<2x8x32xf32>
    %201 = arith.mulf %193, %200 : vector<2x8x32xf32>
    %202 = vector.broadcast %199 : vector<2x1x32xf32> to vector<2x8x32xf32>
    %203 = arith.addf %201, %202 : vector<2x8x32xf32>
    %204 = vector.shape_cast %203 : vector<2x8x32xf32> to vector<16x32xf32>
    %c1_66 = arith.constant 1 : index
    %c0_67 = arith.constant 0 : index
    %c0_68 = arith.constant 0 : index
    %205 = vector.load %arg6[%c1_66, %c0_67, %c0_68] : memref<3x32x64xf32, #tpu.memory_space<vmem>>, vector<1x32x64xf32>
    %206 = vector.shape_cast %205 : vector<1x32x64xf32> to vector<32x64xf32>
    %cst_69 = arith.constant dense<0.000000e+00> : vector<16x64xf32>
    %207 = tpu.matmul %204, %206, %cst_69 {dimension_numbers = #tpu.dot_dimension_numbers<[1], [0], [0], [1], [0, 0, 1, 1], [], []>} : vector<16x32xf32>, vector<32x64xf32>, vector<16x64xf32> -> vector<16x64xf32>
    %c8 = arith.constant 8 : index
    %c0_70 = arith.constant 0 : index
    %208 = vector.load %arg10[%c8, %c0_70] : memref<16x128xf32, #tpu.memory_space<vmem>>, vector<1x64xf32>
    %209 = vector.broadcast %208 : vector<1x64xf32> to vector<16x64xf32>
    %210 = arith.addf %207, %209 : vector<16x64xf32>
    %cst_71 = arith.constant 0.000000e+00 : f32
    %211 = vector.broadcast %cst_71 : f32 to vector<16x64xf32>
    %212 = arith.maximumf %210, %211 : vector<16x64xf32>
    %c1_72 = arith.constant 1 : index
    %c0_73 = arith.constant 0 : index
    %c0_74 = arith.constant 0 : index
    %213 = vector.load %arg7[%c1_72, %c0_73, %c0_74] : memref<3x64x32xf32, #tpu.memory_space<vmem>>, vector<1x64x32xf32>
    %214 = vector.shape_cast %213 : vector<1x64x32xf32> to vector<64x32xf32>
    %cst_75 = arith.constant dense<0.000000e+00> : vector<16x32xf32>
    %215 = tpu.matmul %212, %214, %cst_75 {dimension_numbers = #tpu.dot_dimension_numbers<[1], [0], [0], [1], [0, 0, 1, 1], [], []>} : vector<16x64xf32>, vector<64x32xf32>, vector<16x32xf32> -> vector<16x32xf32>
    %c9 = arith.constant 9 : index
    %c0_76 = arith.constant 0 : index
    %216 = vector.load %arg10[%c9, %c0_76] : memref<16x128xf32, #tpu.memory_space<vmem>>, vector<1x32xf32>
    %217 = vector.broadcast %216 : vector<1x32xf32> to vector<16x32xf32>
    %218 = arith.addf %215, %217 : vector<16x32xf32>
    %219 = arith.addf %204, %218 : vector<16x32xf32>
    %220 = vector.shape_cast %219 : vector<16x32xf32> to vector<2x8x32xf32>
    %cst_77 = arith.constant dense<0.000000e+00> : vector<2x8xf32>
    %221 = vector.multi_reduction <add>, %220, %cst_77 [2] : vector<2x8x32xf32> to vector<2x8xf32>
    %222 = vector.shape_cast %221 : vector<2x8xf32> to vector<2x8x1xf32>
    %cst_78 = arith.constant 3.200000e+01 : f32
    %223 = vector.broadcast %cst_78 : f32 to vector<2x8x1xf32>
    %224 = arith.divf %222, %223 : vector<2x8x1xf32>
    %225 = vector.broadcast %224 : vector<2x8x1xf32> to vector<2x8x32xf32>
    %226 = arith.subf %220, %225 : vector<2x8x32xf32>
    %227 = arith.mulf %226, %226 : vector<2x8x32xf32>
    %cst_79 = arith.constant dense<0.000000e+00> : vector<2x8xf32>
    %228 = vector.multi_reduction <add>, %227, %cst_79 [2] : vector<2x8x32xf32> to vector<2x8xf32>
    %229 = vector.shape_cast %228 : vector<2x8xf32> to vector<2x8x1xf32>
    %cst_80 = arith.constant 3.200000e+01 : f32
    %230 = vector.broadcast %cst_80 : f32 to vector<2x8x1xf32>
    %231 = arith.divf %229, %230 : vector<2x8x1xf32>
    %cst_81 = arith.constant 9.99999974E-6 : f32
    %232 = vector.broadcast %cst_81 : f32 to vector<2x8x1xf32>
    %233 = arith.addf %231, %232 : vector<2x8x1xf32>
    %234 = math.rsqrt %233 : vector<2x8x1xf32>
    %235 = vector.broadcast %234 : vector<2x8x1xf32> to vector<2x8x32xf32>
    %236 = arith.mulf %226, %235 : vector<2x8x32xf32>
    %237 = vector.extract_strided_slice %2 {offsets = [0, 3, 0, 0], sizes = [2, 1, 1, 32], strides = [1, 1, 1, 1]} : vector<2x5x2x32xf32> to vector<2x1x1x32xf32>
    %238 = vector.shape_cast %237 : vector<2x1x1x32xf32> to vector<2x32xf32>
    %239 = vector.shape_cast %238 : vector<2x32xf32> to vector<2x1x32xf32>
    %240 = vector.extract_strided_slice %2 {offsets = [0, 3, 1, 0], sizes = [2, 1, 1, 32], strides = [1, 1, 1, 1]} : vector<2x5x2x32xf32> to vector<2x1x1x32xf32>
    %241 = vector.shape_cast %240 : vector<2x1x1x32xf32> to vector<2x32xf32>
    %242 = vector.shape_cast %241 : vector<2x32xf32> to vector<2x1x32xf32>
    %243 = vector.broadcast %239 : vector<2x1x32xf32> to vector<2x8x32xf32>
    %244 = arith.mulf %236, %243 : vector<2x8x32xf32>
    %245 = vector.broadcast %242 : vector<2x1x32xf32> to vector<2x8x32xf32>
    %246 = arith.addf %244, %245 : vector<2x8x32xf32>
    %247 = vector.shape_cast %246 : vector<2x8x32xf32> to vector<16x32xf32>
    %c2_82 = arith.constant 2 : index
    %c0_83 = arith.constant 0 : index
    %c0_84 = arith.constant 0 : index
    %248 = vector.load %arg6[%c2_82, %c0_83, %c0_84] : memref<3x32x64xf32, #tpu.memory_space<vmem>>, vector<1x32x64xf32>
    %249 = vector.shape_cast %248 : vector<1x32x64xf32> to vector<32x64xf32>
    %cst_85 = arith.constant dense<0.000000e+00> : vector<16x64xf32>
    %250 = tpu.matmul %247, %249, %cst_85 {dimension_numbers = #tpu.dot_dimension_numbers<[1], [0], [0], [1], [0, 0, 1, 1], [], []>} : vector<16x32xf32>, vector<32x64xf32>, vector<16x64xf32> -> vector<16x64xf32>
    %c10 = arith.constant 10 : index
    %c0_86 = arith.constant 0 : index
    %251 = vector.load %arg10[%c10, %c0_86] : memref<16x128xf32, #tpu.memory_space<vmem>>, vector<1x64xf32>
    %252 = vector.broadcast %251 : vector<1x64xf32> to vector<16x64xf32>
    %253 = arith.addf %250, %252 : vector<16x64xf32>
    %cst_87 = arith.constant 0.000000e+00 : f32
    %254 = vector.broadcast %cst_87 : f32 to vector<16x64xf32>
    %255 = arith.maximumf %253, %254 : vector<16x64xf32>
    %c2_88 = arith.constant 2 : index
    %c0_89 = arith.constant 0 : index
    %c0_90 = arith.constant 0 : index
    %256 = vector.load %arg7[%c2_88, %c0_89, %c0_90] : memref<3x64x32xf32, #tpu.memory_space<vmem>>, vector<1x64x32xf32>
    %257 = vector.shape_cast %256 : vector<1x64x32xf32> to vector<64x32xf32>
    %cst_91 = arith.constant dense<0.000000e+00> : vector<16x32xf32>
    %258 = tpu.matmul %255, %257, %cst_91 {dimension_numbers = #tpu.dot_dimension_numbers<[1], [0], [0], [1], [0, 0, 1, 1], [], []>} : vector<16x64xf32>, vector<64x32xf32>, vector<16x32xf32> -> vector<16x32xf32>
    %c11 = arith.constant 11 : index
    %c0_92 = arith.constant 0 : index
    %259 = vector.load %arg10[%c11, %c0_92] : memref<16x128xf32, #tpu.memory_space<vmem>>, vector<1x32xf32>
    %260 = vector.broadcast %259 : vector<1x32xf32> to vector<16x32xf32>
    %261 = arith.addf %258, %260 : vector<16x32xf32>
    %262 = arith.addf %247, %261 : vector<16x32xf32>
    %263 = vector.shape_cast %262 : vector<16x32xf32> to vector<2x8x32xf32>
    %cst_93 = arith.constant dense<0.000000e+00> : vector<2x8xf32>
    %264 = vector.multi_reduction <add>, %263, %cst_93 [2] : vector<2x8x32xf32> to vector<2x8xf32>
    %265 = vector.shape_cast %264 : vector<2x8xf32> to vector<2x8x1xf32>
    %cst_94 = arith.constant 3.200000e+01 : f32
    %266 = vector.broadcast %cst_94 : f32 to vector<2x8x1xf32>
    %267 = arith.divf %265, %266 : vector<2x8x1xf32>
    %268 = vector.broadcast %267 : vector<2x8x1xf32> to vector<2x8x32xf32>
    %269 = arith.subf %263, %268 : vector<2x8x32xf32>
    %270 = arith.mulf %269, %269 : vector<2x8x32xf32>
    %cst_95 = arith.constant dense<0.000000e+00> : vector<2x8xf32>
    %271 = vector.multi_reduction <add>, %270, %cst_95 [2] : vector<2x8x32xf32> to vector<2x8xf32>
    %272 = vector.shape_cast %271 : vector<2x8xf32> to vector<2x8x1xf32>
    %cst_96 = arith.constant 3.200000e+01 : f32
    %273 = vector.broadcast %cst_96 : f32 to vector<2x8x1xf32>
    %274 = arith.divf %272, %273 : vector<2x8x1xf32>
    %cst_97 = arith.constant 9.99999974E-6 : f32
    %275 = vector.broadcast %cst_97 : f32 to vector<2x8x1xf32>
    %276 = arith.addf %274, %275 : vector<2x8x1xf32>
    %277 = math.rsqrt %276 : vector<2x8x1xf32>
    %278 = vector.broadcast %277 : vector<2x8x1xf32> to vector<2x8x32xf32>
    %279 = arith.mulf %269, %278 : vector<2x8x32xf32>
    %280 = vector.extract_strided_slice %2 {offsets = [0, 4, 0, 0], sizes = [2, 1, 1, 32], strides = [1, 1, 1, 1]} : vector<2x5x2x32xf32> to vector<2x1x1x32xf32>
    %281 = vector.shape_cast %280 : vector<2x1x1x32xf32> to vector<2x32xf32>
    %282 = vector.shape_cast %281 : vector<2x32xf32> to vector<2x1x32xf32>
    %283 = vector.extract_strided_slice %2 {offsets = [0, 4, 1, 0], sizes = [2, 1, 1, 32], strides = [1, 1, 1, 1]} : vector<2x5x2x32xf32> to vector<2x1x1x32xf32>
    %284 = vector.shape_cast %283 : vector<2x1x1x32xf32> to vector<2x32xf32>
    %285 = vector.shape_cast %284 : vector<2x32xf32> to vector<2x1x32xf32>
    %286 = vector.broadcast %282 : vector<2x1x32xf32> to vector<2x8x32xf32>
    %287 = arith.mulf %279, %286 : vector<2x8x32xf32>
    %288 = vector.broadcast %285 : vector<2x1x32xf32> to vector<2x8x32xf32>
    %289 = arith.addf %287, %288 : vector<2x8x32xf32>
    %290 = vector.shape_cast %289 : vector<2x8x32xf32> to vector<16x32xf32>
    %c0_98 = arith.constant 0 : index
    %c0_99 = arith.constant 0 : index
    %291 = vector.load %arg9[%c0_98, %c0_99] : memref<32x16xf32, #tpu.memory_space<vmem>>, vector<32x16xf32>
    %cst_100 = arith.constant dense<0.000000e+00> : vector<16x16xf32>
    %292 = tpu.matmul %290, %291, %cst_100 {dimension_numbers = #tpu.dot_dimension_numbers<[1], [0], [0], [1], [0, 0, 1, 1], [], []>} : vector<16x32xf32>, vector<32x16xf32>, vector<16x16xf32> -> vector<16x16xf32>
    %c1_101 = arith.constant 1 : index
    %c0_102 = arith.constant 0 : index
    %293 = vector.load %arg10[%c1_101, %c0_102] : memref<16x128xf32, #tpu.memory_space<vmem>>, vector<1x16xf32>
    %294 = vector.broadcast %293 : vector<1x16xf32> to vector<16x16xf32>
    %295 = arith.addf %292, %294 : vector<16x16xf32>
    %296 = arith.addf %295, %7 : vector<16x16xf32>
    %297 = vector.shape_cast %296 : vector<16x16xf32> to vector<2x8x16xf32>
    %298 = vector.extract_strided_slice %297 {offsets = [0, 0, 0], sizes = [2, 1, 16], strides = [1, 1, 1]} : vector<2x8x16xf32> to vector<2x1x16xf32>
    %299 = vector.shape_cast %298 : vector<2x1x16xf32> to vector<2x16xf32>
    %300 = vector.extract_strided_slice %297 {offsets = [0, 1, 0], sizes = [2, 1, 16], strides = [1, 1, 1]} : vector<2x8x16xf32> to vector<2x1x16xf32>
    %301 = vector.shape_cast %300 : vector<2x1x16xf32> to vector<2x16xf32>
    %302 = vector.extract_strided_slice %297 {offsets = [0, 2, 0], sizes = [2, 1, 16], strides = [1, 1, 1]} : vector<2x8x16xf32> to vector<2x1x16xf32>
    %303 = vector.shape_cast %302 : vector<2x1x16xf32> to vector<2x16xf32>
    %304 = vector.extract_strided_slice %297 {offsets = [0, 3, 0], sizes = [2, 1, 16], strides = [1, 1, 1]} : vector<2x8x16xf32> to vector<2x1x16xf32>
    %305 = vector.shape_cast %304 : vector<2x1x16xf32> to vector<2x16xf32>
    %306 = vector.extract_strided_slice %297 {offsets = [0, 4, 0], sizes = [2, 1, 16], strides = [1, 1, 1]} : vector<2x8x16xf32> to vector<2x1x16xf32>
    %307 = vector.shape_cast %306 : vector<2x1x16xf32> to vector<2x16xf32>
    %308 = vector.extract_strided_slice %297 {offsets = [0, 5, 0], sizes = [2, 1, 16], strides = [1, 1, 1]} : vector<2x8x16xf32> to vector<2x1x16xf32>
    %309 = vector.shape_cast %308 : vector<2x1x16xf32> to vector<2x16xf32>
    %310 = vector.extract_strided_slice %297 {offsets = [0, 6, 0], sizes = [2, 1, 16], strides = [1, 1, 1]} : vector<2x8x16xf32> to vector<2x1x16xf32>
    %311 = vector.shape_cast %310 : vector<2x1x16xf32> to vector<2x16xf32>
    %312 = vector.extract_strided_slice %297 {offsets = [0, 7, 0], sizes = [2, 1, 16], strides = [1, 1, 1]} : vector<2x8x16xf32> to vector<2x1x16xf32>
    %313 = vector.shape_cast %312 : vector<2x1x16xf32> to vector<2x16xf32>
    %314 = tpu.concatenate %299, %301, %303, %305, %307, %309, %311, %313 in 1 : vector<2x16xf32>, vector<2x16xf32>, vector<2x16xf32>, vector<2x16xf32>, vector<2x16xf32>, vector<2x16xf32>, vector<2x16xf32>, vector<2x16xf32> -> vector<2x128xf32>
    %c0_103 = arith.constant 0 : index
    %c0_104 = arith.constant 0 : index
    %315 = vector.load %arg11[%c0_103, %c0_104] : memref<2x128xf32, #tpu.memory_space<vmem>>, vector<2x128xf32>
    tpu.vector_store %arg11[%c0_103, %c0_104], %314 {strides = array<i32>} : memref<2x128xf32, #tpu.memory_space<vmem>>, vector<2x128xf32>,
    return
  }
  func.func @transform_0(%arg0: i32) -> (i32, i32) {
    %c0_i32 = arith.constant 0 : i32
    %c0_i32_0 = arith.constant 0 : i32
    return %arg0, %c0_i32 : i32, i32
  }
  func.func @transform_1(%arg0: i32) -> (i32, i32) {
    %c0_i32 = arith.constant 0 : i32
    %c0_i32_0 = arith.constant 0 : i32
    %c0_i32_1 = arith.constant 0 : i32
    return %c0_i32, %c0_i32_0 : i32, i32
  }
  func.func @transform_2(%arg0: i32) -> (i32, i32, i32, i32) {
    %c0_i32 = arith.constant 0 : i32
    %c0_i32_0 = arith.constant 0 : i32
    %c0_i32_1 = arith.constant 0 : i32
    %c0_i32_2 = arith.constant 0 : i32
    return %arg0, %c0_i32, %c0_i32_0, %c0_i32_1 : i32, i32, i32, i32
  }
  func.func @transform_3(%arg0: i32) -> (i32, i32, i32) {
    %c0_i32 = arith.constant 0 : i32
    %c0_i32_0 = arith.constant 0 : i32
    %c0_i32_1 = arith.constant 0 : i32
    %c0_i32_2 = arith.constant 0 : i32
    return %c0_i32, %c0_i32_0, %c0_i32_1 : i32, i32, i32
  }
  func.func @transform_4(%arg0: i32) -> (i32, i32, i32) {
    %c0_i32 = arith.constant 0 : i32
    %c0_i32_0 = arith.constant 0 : i32
    %c0_i32_1 = arith.constant 0 : i32
    %c0_i32_2 = arith.constant 0 : i32
    return %c0_i32, %c0_i32_0, %c0_i32_1 : i32, i32, i32
  }
  func.func @transform_5(%arg0: i32) -> (i32, i32, i32) {
    %c0_i32 = arith.constant 0 : i32
    %c0_i32_0 = arith.constant 0 : i32
    %c0_i32_1 = arith.constant 0 : i32
    %c0_i32_2 = arith.constant 0 : i32
    return %c0_i32, %c0_i32_0, %c0_i32_1 : i32, i32, i32
  }
  func.func @transform_6(%arg0: i32) -> (i32, i32, i32) {
    %c0_i32 = arith.constant 0 : i32
    %c0_i32_0 = arith.constant 0 : i32
    %c0_i32_1 = arith.constant 0 : i32
    %c0_i32_2 = arith.constant 0 : i32
    return %c0_i32, %c0_i32_0, %c0_i32_1 : i32, i32, i32
  }
  func.func @transform_7(%arg0: i32) -> (i32, i32) {
    %c0_i32 = arith.constant 0 : i32
    %c0_i32_0 = arith.constant 0 : i32
    %c0_i32_1 = arith.constant 0 : i32
    return %c0_i32, %c0_i32_0 : i32, i32
  }
  func.func @transform_8(%arg0: i32) -> (i32, i32) {
    %c0_i32 = arith.constant 0 : i32
    %c0_i32_0 = arith.constant 0 : i32
    %c0_i32_1 = arith.constant 0 : i32
    return %c0_i32, %c0_i32_0 : i32, i32
  }
  func.func @transform_9(%arg0: i32) -> (i32, i32) {
    %c0_i32 = arith.constant 0 : i32
    %c0_i32_0 = arith.constant 0 : i32
    %c0_i32_1 = arith.constant 0 : i32
    return %c0_i32, %c0_i32_0 : i32, i32
  }
  func.func @transform_10(%arg0: i32) -> (i32, i32) {
    %c0_i32 = arith.constant 0 : i32
    %c0_i32_0 = arith.constant 0 : i32
    return %arg0, %c0_i32 : i32, i32
  }
}

</mosaic_0001>

<bundles_post_ra>
// kernel: tpu_custom_call.1
= control target key start
LH: loop header
LB: loop body
LE: loop exit
PB: predicated region body
PF: predicated region fallthrough
CT: control target
= control target key end

     0   :  { %v1592_v2 = vmov 0   ;;  %s2090_s0 = inlined_call_operand.vmem [shape: s32[16,1], index: 0, kind: input, shape index: {}]   ;;  %s2091_s1 = inlined_call_operand.vmem [shape: f32[8,32], index: 1, kind: input, shape index: {}]   ;;  %s2092_s2 = inlined_call_operand.vmem [shape: f32[2,5,2,32], index: 2, kind: input, shape index: {}]   ;;  %s2093_s3 = inlined_call_operand.vmem [shape: f32[2,32,96], index: 3, kind: input, shape index: {}]   ;;  %s2094_s4 = inlined_call_operand.vmem [shape: f32[2,32,32], index: 4, kind: input, shape index: {}]   ;;  %s2095_s5 = inlined_call_operand.vmem [shape: f32[3,32,64], index: 5, kind: input, shape index: {}]   ;;  %s2096_s6 = inlined_call_operand.vmem [shape: f32[3,64,32], index: 6, kind: input, shape index: {}]   ;;  %s2097_s7 = inlined_call_operand.vmem [shape: f32[16,32], index: 7, kind: input, shape index: {}]   ;;  %s2098_s8 = inlined_call_operand.vmem [shape: f32[32,16], index: 8, kind: input, shape index: {}]   ;;  %s2099_s9 = inlined_call_operand.vmem [shape: f32[16,128], index: 9, kind: input, shape index: {}]   ;;  %s2100_s10 = inlined_call_operand.hbm [shape: f32[2,128], index: 10, kind: output, shape index: {}]  }
   0x1   :  { %v36_v0 = vld [vmem:[%s2090_s0] sm:$0xff]  ;;  %v64_v1 = vld [vmem:[%s2097_s7 + $0x8] sm:$0xff]  ;;  %1494 = vset.pattern.permute.xlu0 %v1592_v2 }
   0x2   :  { %88 = vmatpush.msra.mxu0 %v64_v1  ;;  %52 = vperm.xlu0 %1494, %v36_v0  }
   0x3   :  { %15 = vsyncpa [#allocation3], 0  ;;  %v37_v3 = vld [vmem:[%s2090_s0 + $0x8] sm:$0xff]  ;;  %v63_v4 = vld [vmem:[%s2097_s7] sm:$0xff]  ;;  %v49_v6 = vlaneseq  ;;  %vm67_vm0 = vcmask 130048   ;;  %v1593_v9 = vmov 0.0  }
   0x4   :  { %89 = vmatpush.msra.mxu0 %v63_v4  ;;  %v102_v5 = vld [vmem:[%s2093_s3 + $0x18] sm:$0xff]  ;;  %v101_v13 = vld [vmem:[%s2093_s3 + $0x10] sm:$0xff]  ;;  %v100_v14 = vld [vmem:[%s2093_s3 + $0x8] sm:$0xff]  ;;  %vm105_vm3 = vcmask 261120   ;;  %s1595_s13 = smov 96   ;;  %s1596_s14 = smov 80  }
   0x5   :  { %124 = vmatpush.msra.mxu1 %v102_v5  ;;  %v50_v7 = vand.u32 127, %v49_v6  ;;  %v99_v15 = vld [vmem:[%s2093_s3] sm:$0xff]  ;;  %vm245_vm4 = vcmask 64512   ;;  %s1597_s15 = smov 64   ;;  %s1598_s22 = smov 16   ;;  %vm547_vm12 = vcmask 523264  }
   0x6   :  { %v1500_v16 = vld [vmem:[%s2099_s9] ss:$0 sm:$0xff]  ;;  %v1501_v24 = vld [vmem:[%s2099_s9 + $0x2] ss:$0 sm:$0xff] }
   0x7   :  { %125 = vmatpush.msra.mxu1 %v101_v13  ;;  %v38_v17 = vld [vmem:[%s2091_s1] sm:$0xff]  ;;  %s1594_s1 = smov 112  }
   0x9   :  { %126 = vmatpush.msra.mxu1 %v100_v14 }
   0xa   :  { %55 = vperm.xlu0 %1494, %v37_v3  }
   0xb   :  { %127 = vmatpush.msra.mxu1 %v99_v15 }
  0x74   :  { %v53_v8 = vpop.permute.xlu0 %52 }
  0x75   :  { %vm57_vm1 = vcmp.eq.s32.totalorder %v50_v7, %v53_v8 }
  0x76   :  { %v1673_v10 = vsel %vm57_vm1, 1.0, %v1593_v9 }
  0x77   :  { %1403 = vmatmul.msk.f32.vlgmr.msra.gmra.mxu0 %vm67_vm0, %v1673_v10 }
  0x7c   :  { %v56_v11 = vpop.permute.xlu0 %55 }
  0x7d   :  { %vm58_vm2 = vcmp.eq.s32.totalorder %v50_v7, %v56_v11 }
  0x7e   :  { %v1677_v12 = vsel %vm58_vm2, 1.0, %v1593_v9 }
  0x7f   :  { %1404 = vmatmul.msk.f32.gmra.mxu0 %vm67_vm0, %v1677_v12 }
  0xf4   :  { %v91_v18 = vpop.f32.mrf.mxu0 }
  0xf5   :  { %v92_v19 = vadd.f32 %v1500_v16, %v91_v18 }
  0xf7   :  { %v1696_v20 = vadd.f32 %v92_v19, %v38_v17  ;;  %v407_v19 = vld [vmem:[%s2094_s4 + $0x18] sm:$0xff] }
  0xf9   :  { %1405 = vmatmul.msk.f32.vlgmr.msra.gmra.mxu1 %vm105_vm3, %v1696_v20 }
  0xfc   :  { %v94_v21 = vpop.f32.mrf.mxu0 }
  0xfd   :  { %v95_v22 = vadd.f32 %v1500_v16, %v94_v21  ;;  %v406_v21 = vld [vmem:[%s2094_s4 + $0x10] sm:$0xff] }
  0xff   :  { %v1700_v23 = vadd.f32 %v95_v22, %v38_v17  ;;  %v405_v22 = vld [vmem:[%s2094_s4 + $0x8] sm:$0xff] }
 0x101   :  { %1406 = vmatmul.msk.f32.gmra.mxu1 %vm105_vm3, %v1700_v23 }
 0x176   :  { %v129_v25 = vpop.f32.mrf.mxu1 }
 0x177   :  { %v130_v26 = vadd.f32 %v1501_v24, %v129_v25 }
 0x179   :  { %189 = vrot.lane.b32.xlu2 %v130_v26, %s1594_s1  ;;  %136 = vrot.lane.b32.xlu1 %v130_v26, %s1595_s13 }
 0x17e   :  { %v132_v27 = vpop.f32.mrf.mxu1 }
 0x17f   :  { %v133_v28 = vadd.f32 %v1501_v24, %v132_v27 }
 0x181   :  { %191 = vrot.lane.b32.xlu1 %v130_v26, %s1596_s14  ;;  %219 = vrot.lane.b32.xlu0 %v133_v28, %s1596_s14  ;;  %v1495_v43 = vpack.i.bf16 %v133_v28, %v130_v26 }
 0x182   :  { %163 = vrot.lane.b32.xlu2 %v133_v28, %s1595_s13 }
 0x189   :  { %217 = vrot.lane.b32.xlu1 %v133_v28, %s1594_s1 }
 0x1d3   :  { %v190_v29 = vpop.permute.xlu2 %189 }
 0x1dc   :  { %v164_v30 = vpop.permute.xlu2 %163 }
 0x1dd   :  { %1409 = vmatpush.xpose.msk.msra.mxu3 %vm67_vm0, %v164_v30 }
 0x1e0   :  { %1410 = vmatmul.msk.f32.vlgmr.msra.gmra.mxu3 %vm67_vm0, %v133_v28 }
 0x1eb   :  { %v137_v31 = vpop.permute.xlu1 %136 }
 0x1ec   :  { %1407 = vmatpush.xpose.msk.msra.mxu2 %vm67_vm0, %v137_v31 }
 0x1ef   :  { %1408 = vmatmul.msk.f32.vlgmr.msra.gmra.mxu2 %vm67_vm0, %v130_v26  ;;  %v404_v26 = vld [vmem:[%s2094_s4] sm:$0xff] }
 0x1f3   :  { %v192_v32 = vpop.permute.xlu1 %191  ;;  %v220_v33 = vpop.permute.xlu0 %219 }
 0x1f4   :  { %1411 = vmatpush.xpose.msk.msrb.mxu2 %vm67_vm0, %v192_v32  ;;  %1413 = vmatpush.xpose.msk.msrb.mxu3 %vm67_vm0, %v220_v33  ;;  %v1502_v33 = vld [vmem:[%s2099_s9 + $0x3] ss:$0 sm:$0xff] }
 0x1f7   :  { %1412 = vmatmul.msk.f32.vlgmr.msrb.gmra.mxu2 %vm67_vm0, %v190_v29 }
 0x1fb   :  { %v218_v34 = vpop.permute.xlu1 %217 }
 0x1fc   :  { %1414 = vmatmul.msk.f32.vlgmr.msrb.gmra.mxu3 %vm67_vm0, %v218_v34 }
 0x263   :  { %v186_v37 = vpop.f32.mrf.mxu3 }
 0x264   :  { %v249_v42 = vsel %vm245_vm4, %v186_v37, -inf }
 0x272   :  { %v159_v35 = vpop.f32.mrf.mxu2 }
 0x273   :  { %v246_v36 = vsel %vm245_vm4, %v159_v35, -inf }
 0x274   :  { %247 = vmax.xlane.f32.xlu1 %v246_v36 }
 0x27a   :  { %v214_v38 = vpop.f32.mrf.mxu2 }
 0x27b   :  { %v252_v39 = vsel %vm245_vm4, %v214_v38, -inf }
 0x27c   :  { %253 = vmax.xlane.f32.xlu2 %v252_v39 }
 0x27f   :  { %v242_v40 = vpop.f32.mrf.mxu3 }
 0x280   :  { %v255_v41 = vsel %vm245_vm4, %v242_v40, -inf }
 0x281   :  { %256 = vmax.xlane.f32.xlu0 %v255_v41 }
 0x284   :  { %250 = vmax.xlane.f32.xlu2 %v249_v42  ;;  %v1599_v42 = vmov 32.0  }
 0x295   :  { %342 = vrot.lane.b32.xlu0 %v190_v29, %s1597_s15 }
 0x29d   :  { %1496 = vrot.lane.b32.xlu0 %v1495_v43, %s1597_s15 }
 0x2e7   :  { %v248_v47 = vpop.xlane.xlu1 %247 }
 0x2e8   :  { %v258_v50 = vsub.f32 %v159_v35, %v248_v47 }
 0x2ea   :  { %v262_v53 = vmul.f32 1.442695, %v258_v50 }
 0x2ef   :  { %v254_v44 = vpop.xlane.xlu2 %253 }
 0x2f0   :  { %v260_v45 = vsub.f32 %v214_v38, %v254_v44 }
 0x2f2   :  { %v266_v46 = vmul.f32 1.442695, %v260_v45 }
 0x2f4   :  { %1512 = vpow2.f32 %v266_v46  ;;  %v257_v48 = vpop.xlane.xlu0 %256 }
 0x2f5   :  { %v261_v49 = vsub.f32 %v242_v40, %v257_v48 }
 0x2f7   :  { %v268_v51 = vmul.f32 1.442695, %v261_v49  ;;  %v251_v55 = vpop.xlane.xlu2 %250 }
 0x2f8   :  { %v259_v57 = vsub.f32 %v186_v37, %v251_v55 }
 0x2f9   :  { %1514 = vpow2.f32 %v268_v51 }
 0x2fa   :  { %v1513_v52 = vpop.eup %1512  ;;  %1516 = vpow2.f32 %v262_v53  ;;  %v264_v59 = vmul.f32 1.442695, %v259_v57  ;;  %v503_v57 = vld [vmem:[%s2095_s5 + $0x18] sm:$0xff] }
 0x2fb   :  { %v276_v54 = vsel %vm245_vm4, %v1513_v52, 0.0 }
 0x2fc   :  { %277 = vadd.xlane.f32.xlu2 %v276_v54  ;;  %1518 = vpow2.f32 %v264_v59  ;;  %v501_v59 = vld [vmem:[%s2095_s5 + $0x8] sm:$0xff] }
 0x2ff   :  { %v1515_v56 = vpop.eup %1514 }
 0x300   :  { %v279_v58 = vsel %vm245_vm4, %v1515_v56, 0.0  ;;  %v1517_v60 = vpop.eup %1516 }
 0x301   :  { %280 = vadd.xlane.f32.xlu1 %v279_v58  ;;  %v270_v62 = vsel %vm245_vm4, %v1517_v60, 0.0  ;;  %v502_v58 = vld [vmem:[%s2095_s5 + $0x10] sm:$0xff] }
 0x302   :  { %v1519_v63 = vpop.eup %1518 }
 0x303   :  { %v273_v2 = vsel %vm245_vm4, %v1519_v63, 0.0 }
 0x307   :  { %v343_v61 = vpop.permute.xlu0 %342 }
 0x308   :  { %363 = vmatpush.msra.mxu3 %v343_v61 }
 0x309   :  { %271 = vadd.xlane.f32.xlu1 %v270_v62 }
 0x30f   :  { %v1497_v0 = vpop.permute.xlu0 %1496 }
 0x310   :  { %v1499_v1 = vunpack.i.h.bf16 %v1497_v0  ;;  %v1498_v3 = vunpack.i.l.bf16 %v1497_v0  ;;  %v544_v0 = vld [vmem:[%s2096_s6 + $0x38] sm:$0xff] }
 0x311   :  { %274 = vadd.xlane.f32.xlu1 %v273_v2  ;;  %562 = vmatpush.msrb.mxu3 %v544_v0  ;;  %v542_v2 = vld [vmem:[%s2096_s6 + $0x28] sm:$0xff] }
 0x312   :  { %311 = vmatpush.msrb.mxu0 %v1498_v3  ;;  %337 = vmatpush.msra.mxu2 %v1499_v1  ;;  %v543_v1 = vld [vmem:[%s2096_s6 + $0x30] sm:$0xff] }
 0x313   :  { %563 = vmatpush.msrb.mxu3 %v543_v1 }
 0x314   :  { %368 = vrot.lane.b32.xlu2 %v218_v34, %s1597_s15  ;;  %428 = vmatpush.msra.mxu0 %v407_v19 }
 0x315   :  { %524 = vmatpush.msrb.mxu2 %v503_v57  ;;  %564 = vmatpush.msrb.mxu3 %v542_v2  ;;  %v1428_v2 = vld [vmem:[%s2093_s3 + $0x38] sm:$0xff] }
 0x316   :  { %429 = vmatpush.msra.mxu0 %v406_v21 }
 0x317   :  { %525 = vmatpush.msrb.mxu2 %v502_v58 }
 0x318   :  { %430 = vmatpush.msra.mxu0 %v405_v22 }
 0x319   :  { %526 = vmatpush.msrb.mxu2 %v501_v59 }
 0x31a   :  { %431 = vmatpush.msra.mxu0 %v404_v26 }
 0x36f   :  { %v278_v4 = vpop.xlane.xlu2 %277 }
 0x370   :  { %1520 = vrcp.f32 %v278_v4 }
 0x374   :  { %v281_v5 = vpop.xlane.xlu1 %280 }
 0x375   :  { %1522 = vrcp.f32 %v281_v5  ;;  %v541_v5 = vld [vmem:[%s2096_s6 + $0x20] sm:$0xff] }
 0x376   :  { %v1521_v6 = vpop.eup %1520  ;;  %565 = vmatpush.msrb.mxu3 %v541_v5  ;;  %v1425_v5 = vld [vmem:[%s2093_s3 + $0x20] sm:$0xff] }
 0x377   :  { %v288_v7 = vmul.f32 %v1521_v6, %v1513_v52  ;;  %v369_v8 = vpop.permute.xlu2 %368 }
 0x378   :  { %389 = vmatpush.msrb.mxu1 %v369_v8  ;;  %v540_v8 = vld [vmem:[%s2096_s6 + $0x18] sm:$0xff] }
 0x379   :  { %1417 = vmatmul.msk.f32.vlgmr.msra.gmra.mxu3 %vm245_vm4, %v288_v7 }
 0x37a   :  { %566 = vmatpush.msrb.mxu3 %v540_v8  ;;  %656 = vmatpush.msra.mxu1 %v1428_v2 }
 0x37b   :  { %v1523_v9 = vpop.eup %1522 }
 0x37c   :  { %v272_v11 = vpop.xlane.xlu1 %271  ;;  %v289_v13 = vmul.f32 %v1523_v9, %v1515_v56 }
 0x37d   :  { %1524 = vrcp.f32 %v272_v11 }
 0x37e   :  { %1418 = vmatmul.msk.f32.vlgmr.msrb.gmra.mxu1 %vm245_vm4, %v289_v13 }
 0x383   :  { %v1525_v14 = vpop.eup %1524 }
 0x384   :  { %v275_v15 = vpop.xlane.xlu1 %274  ;;  %v286_v16 = vmul.f32 %v1525_v14, %v1517_v60  ;;  %v500_v60 = vld [vmem:[%s2095_s5] sm:$0xff] }
 0x385   :  { %1526 = vrcp.f32 %v275_v15  ;;  %527 = vmatpush.msrb.mxu2 %v500_v60  ;;  %v39_v14 = vld [vmem:[%s2092_s2] sm:$0x3] }
 0x386   :  { %1415 = vmatmul.msk.f32.vlgmr.msrb.gmra.mxu0 %vm245_vm4, %v286_v16  ;;  %1528 = vrcp.f32 %v1599_v42  ;;  %v492_v19 = vperm.slane %v39_v14, 0 }
 0x38b   :  { %v1527_v17 = vpop.eup %1526 }
 0x38c   :  { %v287_v18 = vmul.f32 %v1527_v17, %v1519_v63  ;;  %v1529_v43 = vpop.eup %1528 }
 0x38d   :  { %v448_v44 = vmul.f32 32.0, %v1529_v43  ;;  %vm452_vm5 = vweird.f32 %v1529_v43 }
 0x38e   :  { %1416 = vmatmul.msk.f32.vlgmr.msra.gmra.mxu2 %vm245_vm4, %v287_v18 }
 0x38f   :  { %v449_v45 = vsub.f32 1.0, %v448_v44 }
 0x391   :  { %v450_v46 = vmul.f32 %v1529_v43, %v449_v45 }
 0x393   :  { %v451_v47 = vadd.f32 %v1529_v43, %v450_v46 }
 0x395   :  { %v1761_v48 = vsel %vm452_vm5, %v1529_v43, %v451_v47 }
 0x3fb   :  { %v391_v24 = vpop.f32.mrf.mxu1 }
 0x3fc   :  { %v365_v25 = vpop.f32.mrf.mxu3  ;;  %398 = vrot.lane.b32.xlu0 %v391_v24, %s1598_s22 }
 0x3fd   :  { %396 = vrot.lane.b32.xlu1 %v365_v25, %s1598_s22  ;;  %v496_v25 = vperm.slane %v39_v14, 1 }
 0x403   :  { %v313_v27 = vpop.f32.mrf.mxu0 }
 0x411   :  { %v339_v31 = vpop.f32.mrf.mxu2 }
 0x46e   :  { %v399_v30 = vpop.permute.xlu0 %398 }
 0x46f   :  { %v397_v28 = vpop.permute.xlu1 %396  ;;  %v403_v32 = vsel %vm67_vm0, %v339_v31, %v399_v30 }
 0x470   :  { %v402_v29 = vsel %vm67_vm0, %v313_v27, %v397_v28 }
 0x471   :  { %1419 = vmatmul.msk.f32.vlgmr.msra.gmra.mxu0 %vm105_vm3, %v402_v29  ;;  %v44_v29 = vld [vmem:[%s2092_s2 + $0xa] sm:$0x3] }
 0x479   :  { %1420 = vmatmul.msk.f32.gmra.mxu0 %vm105_vm3, %v403_v32  ;;  %v493_v32 = vperm.slane %v44_v29, 0 }
 0x4ee   :  { %v433_v34 = vpop.f32.mrf.mxu0 }
 0x4ef   :  { %v434_v35 = vadd.f32 %v1502_v33, %v433_v34 }
 0x4f1   :  { %v439_v36 = vadd.f32 %v434_v35, %v1696_v20  ;;  %v497_v35 = vperm.slane %v44_v29, 1 }
 0x4f3   :  { %v441_v37 = vsel %vm105_vm3, %v439_v36, 0.0 }
 0x4f4   :  { %442 = vadd.xlane.f32.xlu2 %v441_v37 }
 0x4f6   :  { %v436_v38 = vpop.f32.mrf.mxu0 }
 0x4f7   :  { %v437_v39 = vadd.f32 %v1502_v33, %v436_v38  ;;  %v539_v38 = vld [vmem:[%s2096_s6 + $0x10] sm:$0xff] }
 0x4f8   :  { %567 = vmatpush.msrb.mxu3 %v539_v38 }
 0x4f9   :  { %v440_v40 = vadd.f32 %v437_v39, %v1700_v23  ;;  %v538_v39 = vld [vmem:[%s2096_s6 + $0x8] sm:$0xff] }
 0x4fa   :  { %568 = vmatpush.msrb.mxu3 %v538_v39 }
 0x4fb   :  { %v444_v41 = vsel %vm105_vm3, %v440_v40, 0.0 }
 0x4fc   :  { %445 = vadd.xlane.f32.xlu0 %v444_v41  ;;  %v1503_v41 = vld [vmem:[%s2099_s9 + $0x6] ss:$0 sm:$0xff] }
 0x567   :  { %v443_v20 = vpop.xlane.xlu2 %442 }
 0x568   :  { %v454_v49 = vmul.f32 %v1761_v48, %v443_v20  ;;  %v1504_v20 = vld [vmem:[%s2099_s9 + $0x7] ss:$0 sm:$0xff] }
 0x56a   :  { %v456_v50 = vsub.f32 %v439_v36, %v454_v49 }
 0x56c   :  { %v458_v51 = vmul.f32 %v456_v50, %v456_v50 }
 0x56e   :  { %v460_v23 = vsel %vm105_vm3, %v458_v51, 0.0 }
 0x56f   :  { %v446_v52 = vpop.xlane.xlu0 %445  ;;  %461 = vadd.xlane.f32.xlu1 %v460_v23 }
 0x570   :  { %v455_v53 = vmul.f32 %v1761_v48, %v446_v52 }
 0x572   :  { %v457_v54 = vsub.f32 %v440_v40, %v455_v53  ;;  %v537_v40 = vld [vmem:[%s2096_s6] sm:$0xff] }
 0x573   :  { %569 = vmatpush.msrb.mxu3 %v537_v40 }
 0x574   :  { %v459_v55 = vmul.f32 %v457_v54, %v457_v54 }
 0x576   :  { %v463_v56 = vsel %vm105_vm3, %v459_v55, 0.0 }
 0x577   :  { %464 = vadd.xlane.f32.xlu2 %v463_v56 }
 0x5e2   :  { %v462_v61 = vpop.xlane.xlu1 %461 }
 0x5e3   :  { %v466_v62 = vmul.f32 %v462_v61, %v1761_v48 }
 0x5e5   :  { %v468_v63 = vadd.f32 1e-05, %v466_v62 }
 0x5e7   :  { %1530 = vrsqrt.f32 %v468_v63  ;;  %vm476_vm7 = vweird.f32 %v468_v63 }
 0x5ea   :  { %v465_v3 = vpop.xlane.xlu2 %464 }
 0x5eb   :  { %v467_v4 = vmul.f32 %v465_v3, %v1761_v48  ;;  %v1427_v3 = vld [vmem:[%s2093_s3 + $0x30] sm:$0xff] }
 0x5ec   :  { %657 = vmatpush.msra.mxu1 %v1427_v3 }
 0x5ed   :  { %v1531_v6 = vpop.eup %1530  ;;  %v469_v7 = vadd.f32 1e-05, %v467_v4  ;;  %v1426_v4 = vld [vmem:[%s2093_s3 + $0x28] sm:$0xff] }
 0x5ee   :  { %v471_v9 = vmul.f32 %v1531_v6, %v468_v63  ;;  %vm477_vm6 = vweird.f32 %v1531_v6  ;;  %658 = vmatpush.msra.mxu1 %v1426_v4 }
 0x5ef   :  { %1532 = vrsqrt.f32 %v469_v7  ;;  %vm478_vm8 = vmor %vm476_vm7, %vm477_vm6  ;;  %vm486_vm10 = vweird.f32 %v469_v7 }
 0x5f0   :  { %v472_v11 = vmul.f32 %v1531_v6, %v471_v9  ;;  %659 = vmatpush.msra.mxu1 %v1425_v5 }
 0x5f2   :  { %v473_v13 = vmul.f32 0.5, %v472_v11 }
 0x5f4   :  { %v474_v15 = vsub.f32 1.5, %v473_v13 }
 0x5f5   :  { %v1533_v16 = vpop.eup %1532 }
 0x5f6   :  { %v475_v17 = vmul.f32 %v1531_v6, %v474_v15  ;;  %v481_v18 = vmul.f32 %v1533_v16, %v469_v7  ;;  %vm487_vm9 = vweird.f32 %v1533_v16 }
 0x5f7   :  { %vm488_vm11 = vmor %vm486_vm10, %vm487_vm9 }
 0x5f8   :  { %v479_v21 = vsel %vm478_vm8, %v1531_v6, %v475_v17  ;;  %v482_v22 = vmul.f32 %v1533_v16, %v481_v18  ;;  %v40_v18 = vld [vmem:[%s2092_s2 + $0x2] sm:$0x3] }
 0x5f9   :  { %v490_v24 = vmul.f32 %v479_v21, %v456_v50  ;;  %v627_v29 = vperm.slane %v40_v18, 1 }
 0x5fa   :  { %v483_v26 = vmul.f32 0.5, %v482_v22 }
 0x5fb   :  { %v494_v27 = vmul.f32 %v492_v19, %v490_v24 }
 0x5fc   :  { %v484_v28 = vsub.f32 1.5, %v483_v26 }
 0x5fd   :  { %v498_v30 = vadd.f32 %v496_v25, %v494_v27  ;;  %v623_v25 = vperm.slane %v40_v18, 0 }
 0x5fe   :  { %v485_v31 = vmul.f32 %v1533_v16, %v484_v28 }
 0x5ff   :  { %1421 = vmatmul.msk.f32.vlgmr.msrb.gmra.mxu2 %vm105_vm3, %v498_v30 }
 0x600   :  { %v489_v33 = vsel %vm488_vm11, %v1533_v16, %v485_v31 }
 0x601   :  { %v491_v34 = vmul.f32 %v489_v33, %v457_v54  ;;  %v45_v33 = vld [vmem:[%s2092_s2 + $0xc] sm:$0x3] }
 0x602   :  { %v628_v39 = vperm.slane %v45_v33, 1 }
 0x603   :  { %v495_v36 = vmul.f32 %v493_v32, %v491_v34 }
 0x605   :  { %v499_v37 = vadd.f32 %v497_v35, %v495_v36  ;;  %v624_v36 = vperm.slane %v45_v33, 0 }
 0x607   :  { %1422 = vmatmul.msk.f32.gmra.mxu2 %vm105_vm3, %v499_v37 }
 0x682   :  { %v529_v42 = vpop.f32.mrf.mxu2 }
 0x683   :  { %v530_v43 = vadd.f32 %v1503_v41, %v529_v42  ;;  %v1505_v42 = vld [vmem:[%s2099_s9 + $0x4] ss:$0 sm:$0xff] }
 0x685   :  { %v535_v44 = vmax.f32 %v530_v43, 0.0 }
 0x687   :  { %1423 = vmatmul.msk.f32.vlgmr.msrb.gmra.mxu3 %vm547_vm12, %v535_v44 }
 0x68a   :  { %v532_v45 = vpop.f32.mrf.mxu2 }
 0x68b   :  { %v533_v46 = vadd.f32 %v1503_v41, %v532_v45 }
 0x68d   :  { %v536_v47 = vmax.f32 %v533_v46, 0.0 }
 0x68f   :  { %1424 = vmatmul.msk.f32.gmra.mxu3 %vm547_vm12, %v536_v47 }
 0x70a   :  { %v571_v49 = vpop.f32.mrf.mxu3 }
 0x70b   :  { %v572_v50 = vadd.f32 %v1504_v20, %v571_v49 }
 0x70d   :  { %v577_v51 = vadd.f32 %v572_v50, %v498_v30 }
 0x70f   :  { %v579_v23 = vsel %vm105_vm3, %v577_v51, 0.0 }
 0x710   :  { %580 = vadd.xlane.f32.xlu0 %v579_v23 }
 0x712   :  { %v574_v52 = vpop.f32.mrf.mxu3 }
 0x713   :  { %v575_v53 = vadd.f32 %v1504_v20, %v574_v52 }
 0x715   :  { %v578_v54 = vadd.f32 %v575_v53, %v499_v37 }
 0x717   :  { %v582_v55 = vsel %vm105_vm3, %v578_v54, 0.0 }
 0x718   :  { %583 = vadd.xlane.f32.xlu2 %v582_v55 }
 0x783   :  { %v581_v56 = vpop.xlane.xlu0 %580 }
 0x784   :  { %v585_v57 = vmul.f32 %v581_v56, %v1761_v48 }
 0x786   :  { %v587_v58 = vsub.f32 %v577_v51, %v585_v57 }
 0x788   :  { %v589_v59 = vmul.f32 %v587_v58, %v587_v58 }
 0x78a   :  { %v591_v60 = vsel %vm105_vm3, %v589_v59, 0.0 }
 0x78b   :  { %592 = vadd.xlane.f32.xlu0 %v591_v60  ;;  %v584_v61 = vpop.xlane.xlu2 %583 }
 0x78c   :  { %v586_v62 = vmul.f32 %v584_v61, %v1761_v48 }
 0x78e   :  { %v588_v63 = vsub.f32 %v578_v54, %v586_v62 }
 0x790   :  { %v590_v0 = vmul.f32 %v588_v63, %v588_v63 }
 0x792   :  { %v594_v1 = vsel %vm105_vm3, %v590_v0, 0.0 }
 0x793   :  { %595 = vadd.xlane.f32.xlu2 %v594_v1 }
 0x7fe   :  { %v593_v6 = vpop.xlane.xlu0 %592 }
 0x7ff   :  { %v597_v7 = vmul.f32 %v593_v6, %v1761_v48 }
 0x801   :  { %v599_v8 = vadd.f32 1e-05, %v597_v7 }
 0x803   :  { %1534 = vrsqrt.f32 %v599_v8  ;;  %vm607_vm14 = vweird.f32 %v599_v8 }
 0x806   :  { %v596_v9 = vpop.xlane.xlu2 %595 }
 0x807   :  { %v598_v11 = vmul.f32 %v596_v9, %v1761_v48 }
 0x809   :  { %v1535_v13 = vpop.eup %1534  ;;  %v600_v14 = vadd.f32 1e-05, %v598_v11 }
 0x80a   :  { %v602_v15 = vmul.f32 %v1535_v13, %v599_v8  ;;  %vm608_vm13 = vweird.f32 %v1535_v13 }
 0x80b   :  { %1536 = vrsqrt.f32 %v600_v14  ;;  %vm609_vm15 = vmor %vm607_vm14, %vm608_vm13  ;;  %vm617_vm2 = vweird.f32 %v600_v14 }
 0x80c   :  { %v603_v16 = vmul.f32 %v1535_v13, %v602_v15 }
 0x80e   :  { %v604_v17 = vmul.f32 0.5, %v603_v16 }
 0x810   :  { %v605_v19 = vsub.f32 1.5, %v604_v17 }
 0x811   :  { %v1537_v21 = vpop.eup %1536 }
 0x812   :  { %v606_v22 = vmul.f32 %v1535_v13, %v605_v19  ;;  %v612_v24 = vmul.f32 %v1537_v21, %v600_v14  ;;  %vm618_vm1 = vweird.f32 %v1537_v21 }
 0x813   :  { %vm619_vm5 = vmor %vm617_vm2, %vm618_vm1 }
 0x814   :  { %v610_v26 = vsel %vm609_vm15, %v1535_v13, %v606_v22  ;;  %v613_v27 = vmul.f32 %v1537_v21, %v612_v24 }
 0x815   :  { %v621_v28 = vmul.f32 %v610_v26, %v587_v58 }
 0x816   :  { %v614_v30 = vmul.f32 0.5, %v613_v27 }
 0x817   :  { %v625_v31 = vmul.f32 %v623_v25, %v621_v28 }
 0x818   :  { %v615_v32 = vsub.f32 1.5, %v614_v30 }
 0x819   :  { %v1847_v34 = vadd.f32 %v627_v29, %v625_v31 }
 0x81a   :  { %v616_v35 = vmul.f32 %v1537_v21, %v615_v32 }
 0x81b   :  { %1429 = vmatmul.msk.f32.vlgmr.msra.gmra.mxu1 %vm105_vm3, %v1847_v34 }
 0x81c   :  { %v620_v37 = vsel %vm619_vm5, %v1537_v21, %v616_v35 }
 0x81d   :  { %v622_v38 = vmul.f32 %v620_v37, %v588_v63  ;;  %v1446_v37 = vld [vmem:[%s2094_s4 + $0x38] sm:$0xff] }
 0x81f   :  { %v626_v40 = vmul.f32 %v624_v36, %v622_v38  ;;  %v1445_v38 = vld [vmem:[%s2094_s4 + $0x30] sm:$0xff] }
 0x821   :  { %v1851_v41 = vadd.f32 %v628_v39, %v626_v40  ;;  %v1444_v39 = vld [vmem:[%s2094_s4 + $0x28] sm:$0xff] }
 0x823   :  { %1430 = vmatmul.msk.f32.gmra.mxu1 %vm105_vm3, %v1851_v41 }
 0x898   :  { %v661_v43 = vpop.f32.mrf.mxu1 }
 0x899   :  { %v662_v44 = vadd.f32 %v1505_v42, %v661_v43  ;;  %v1443_v43 = vld [vmem:[%s2094_s4 + $0x20] sm:$0xff] }
 0x89b   :  { %723 = vrot.lane.b32.xlu0 %v662_v44, %s1596_s14  ;;  %668 = vrot.lane.b32.xlu1 %v662_v44, %s1595_s13 }
 0x89c   :  { %721 = vrot.lane.b32.xlu2 %v662_v44, %s1594_s1 }
 0x8a0   :  { %v664_v45 = vpop.f32.mrf.mxu1 }
 0x8a1   :  { %v1861_v46 = vadd.f32 %v1505_v42, %v664_v45 }
 0x8a3   :  { %749 = vrot.lane.b32.xlu1 %v1861_v46, %s1594_s1  ;;  %751 = vrot.lane.b32.xlu0 %v1861_v46, %s1596_s14 }
 0x8a4   :  { %695 = vrot.lane.b32.xlu2 %v1861_v46, %s1595_s13 }
 0x8f6   :  { %v722_v47 = vpop.permute.xlu2 %721 }
 0x8fe   :  { %v696_v20 = vpop.permute.xlu2 %695 }
 0x8ff   :  { %1433 = vmatpush.xpose.msk.msra.mxu2 %vm67_vm0, %v696_v20 }
 0x902   :  { %1434 = vmatmul.msk.f32.vlgmr.msra.gmra.mxu2 %vm67_vm0, %v1861_v46 }
 0x90d   :  { %v724_v49 = vpop.permute.xlu0 %723  ;;  %v669_v50 = vpop.permute.xlu1 %668 }
 0x90e   :  { %1431 = vmatpush.xpose.msk.msrb.mxu0 %vm67_vm0, %v669_v50  ;;  %1435 = vmatpush.xpose.msk.msrb.mxu1 %vm67_vm0, %v724_v49  ;;  %v1506_v50 = vld [vmem:[%s2099_s9 + $0x5] ss:$0 sm:$0xff] }
 0x911   :  { %1432 = vmatmul.msk.f32.vlgmr.msrb.gmra.mxu0 %vm67_vm0, %v662_v44  ;;  %1436 = vmatmul.msk.f32.vlgmr.msrb.gmra.mxu1 %vm67_vm0, %v722_v47 }
 0x915   :  { %v752_v51 = vpop.permute.xlu0 %751  ;;  %v750_v23 = vpop.permute.xlu1 %749 }
 0x916   :  { %1437 = vmatpush.xpose.msk.msra.mxu0 %vm67_vm0, %v752_v51 }
 0x919   :  { %1438 = vmatmul.msk.f32.vlgmr.msra.gmra.mxu0 %vm67_vm0, %v750_v23 }
 0x985   :  { %v718_v56 = vpop.f32.mrf.mxu2 }
 0x986   :  { %v780_v59 = vsel %vm245_vm4, %v718_v56, -inf }
 0x98e   :  { %v691_v52 = vpop.f32.mrf.mxu0  ;;  %v746_v53 = vpop.f32.mrf.mxu1 }
 0x98f   :  { %v777_v54 = vsel %vm245_vm4, %v691_v52, -inf  ;;  %v783_v55 = vsel %vm245_vm4, %v746_v53, -inf }
 0x990   :  { %778 = vmax.xlane.f32.xlu2 %v777_v54  ;;  %784 = vmax.xlane.f32.xlu0 %v783_v55 }
 0x996   :  { %v774_v57 = vpop.f32.mrf.mxu0 }
 0x997   :  { %v786_v58 = vsel %vm245_vm4, %v774_v57, -inf }
 0x998   :  { %787 = vmax.xlane.f32.xlu1 %v786_v58  ;;  %781 = vmax.xlane.f32.xlu0 %v780_v59 }
 0x9ac   :  { %873 = vrot.lane.b32.xlu0 %v722_v47, %s1597_s15 }
 0x9b4   :  { %821 = vrot.lane.b32.xlu0 %v662_v44, %s1597_s15 }
 0xa03   :  { %v785_v60 = vpop.xlane.xlu0 %784  ;;  %v779_v61 = vpop.xlane.xlu2 %778 }
 0xa04   :  { %v791_v62 = vsub.f32 %v746_v53, %v785_v60  ;;  %v789_v63 = vsub.f32 %v691_v52, %v779_v61 }
 0xa06   :  { %v797_v0 = vmul.f32 1.442695, %v791_v62  ;;  %v793_v1 = vmul.f32 1.442695, %v789_v63 }
 0xa08   :  { %1538 = vpow2.f32 %v797_v0 }
 0xa09   :  { %1540 = vpow2.f32 %v793_v1 }
 0xa0b   :  { %v788_v2 = vpop.xlane.xlu1 %787  ;;  %v782_v4 = vpop.xlane.xlu0 %781 }
 0xa0c   :  { %v792_v3 = vsub.f32 %v774_v57, %v788_v2  ;;  %v790_v8 = vsub.f32 %v718_v56, %v782_v4  ;;  %v1450_v4 = vld [vmem:[%s2095_s5 + $0x28] sm:$0xff] }
 0xa0e   :  { %v1539_v5 = vpop.eup %1538  ;;  %v799_v6 = vmul.f32 1.442695, %v792_v3  ;;  %v795_v13 = vmul.f32 1.442695, %v790_v8  ;;  %v1451_v3 = vld [vmem:[%s2095_s5 + $0x30] sm:$0xff] }
 0xa0f   :  { %v1541_v7 = vpop.eup %1540  ;;  %v807_v9 = vsel %vm245_vm4, %v1539_v5, 0.0 }
 0xa10   :  { %1542 = vpow2.f32 %v799_v6  ;;  %808 = vadd.xlane.f32.xlu1 %v807_v9  ;;  %v801_v11 = vsel %vm245_vm4, %v1541_v7, 0.0 }
 0xa11   :  { %802 = vadd.xlane.f32.xlu2 %v801_v11  ;;  %1544 = vpow2.f32 %v795_v13  ;;  %v1462_v13 = vld [vmem:[%s2096_s6 + $0x78] sm:$0xff] }
 0xa16   :  { %v1543_v14 = vpop.eup %1542 }
 0xa17   :  { %v810_v15 = vsel %vm245_vm4, %v1543_v14, 0.0  ;;  %v1545_v16 = vpop.eup %1544 }
 0xa18   :  { %v804_v18 = vsel %vm245_vm4, %v1545_v16, 0.0 }
 0xa19   :  { %811 = vadd.xlane.f32.xlu2 %v810_v15 }
 0xa1e   :  { %v874_v17 = vpop.permute.xlu0 %873 }
 0xa1f   :  { %894 = vmatpush.msra.mxu1 %v874_v17 }
 0xa21   :  { %805 = vadd.xlane.f32.xlu2 %v804_v18  ;;  %1088 = vmatpush.msrb.mxu1 %v1462_v13  ;;  %v1468_v13 = vld [vmem:[%s2095_s5 + $0x58] sm:$0xff] }
 0xa26   :  { %v822_v19 = vpop.permute.xlu0 %821 }
 0xa27   :  { %842 = vmatpush.msrb.mxu2 %v822_v19 }
 0xa29   :  { %899 = vrot.lane.b32.xlu1 %v750_v23, %s1597_s15  ;;  %960 = vmatpush.msra.mxu2 %v1446_v37 }
 0xa2b   :  { %961 = vmatpush.msra.mxu2 %v1445_v38 }
 0xa2d   :  { %962 = vmatpush.msra.mxu2 %v1444_v39 }
 0xa2f   :  { %963 = vmatpush.msra.mxu2 %v1443_v43 }
 0xa39   :  { %847 = vrot.lane.b32.xlu2 %v1861_v46, %s1597_s15 }
 0xa83   :  { %v809_v21 = vpop.xlane.xlu1 %808 }
 0xa84   :  { %1546 = vrcp.f32 %v809_v21  ;;  %v803_v22 = vpop.xlane.xlu2 %802  ;;  %v1459_v21 = vld [vmem:[%s2096_s6 + $0x60] sm:$0xff] }
 0xa85   :  { %1548 = vrcp.f32 %v803_v22  ;;  %v41_v22 = vld [vmem:[%s2092_s2 + $0x4] sm:$0x3] }
 0xa8a   :  { %v1547_v24 = vpop.eup %1546 }
 0xa8b   :  { %v1549_v25 = vpop.eup %1548  ;;  %v819_v26 = vmul.f32 %v1547_v24, %v1539_v5  ;;  %v1449_v5 = vld [vmem:[%s2095_s5 + $0x20] sm:$0xff] }
 0xa8c   :  { %v817_v27 = vmul.f32 %v1549_v25, %v1541_v7  ;;  %v812_v28 = vpop.xlane.xlu2 %811 }
 0xa8d   :  { %1441 = vmatmul.msk.f32.vlgmr.msra.gmra.mxu1 %vm245_vm4, %v819_v26  ;;  %1550 = vrcp.f32 %v812_v28  ;;  %v1458_v26 = vld [vmem:[%s2096_s6 + $0x58] sm:$0xff]  ;;  %v1017_v28 = vperm.slane %v41_v22, 0 }
 0xa8e   :  { %1439 = vmatmul.msk.f32.vlgmr.msrb.gmra.mxu2 %vm245_vm4, %v817_v27 }
 0xa93   :  { %v1551_v30 = vpop.eup %1550 }
 0xa94   :  { %v806_v29 = vpop.xlane.xlu2 %805  ;;  %v820_v32 = vmul.f32 %v1551_v30, %v1543_v14  ;;  %v1461_v14 = vld [vmem:[%s2096_s6 + $0x70] sm:$0xff] }
 0xa95   :  { %1552 = vrcp.f32 %v806_v29  ;;  %1089 = vmatpush.msrb.mxu1 %v1461_v14  ;;  %v1467_v14 = vld [vmem:[%s2095_s5 + $0x50] sm:$0xff] }
 0xa9b   :  { %v1553_v31 = vpop.eup %1552  ;;  %v900_v33 = vpop.permute.xlu1 %899 }
 0xa9c   :  { %v818_v35 = vmul.f32 %v1553_v31, %v1545_v16  ;;  %v848_v36 = vpop.permute.xlu2 %847  ;;  %920 = vmatpush.msrb.mxu0 %v900_v33  ;;  %v1460_v16 = vld [vmem:[%s2096_s6 + $0x68] sm:$0xff]  ;;  %v1021_v31 = vperm.slane %v41_v22, 1 }
 0xa9d   :  { %868 = vmatpush.msra.mxu3 %v848_v36  ;;  %1442 = vmatmul.msk.f32.vlgmr.msrb.gmra.mxu0 %vm245_vm4, %v820_v32 }
 0xa9e   :  { %1440 = vmatmul.msk.f32.vlgmr.msra.gmra.mxu3 %vm245_vm4, %v818_v35  ;;  %1090 = vmatpush.msrb.mxu1 %v1460_v16  ;;  %v1465_v16 = vld [vmem:[%s2095_s5 + $0x40] sm:$0xff] }
 0xa9f   :  { %1182 = vmatpush.msra.mxu0 %v1468_v13 }
 0xaa0   :  { %1091 = vmatpush.msrb.mxu1 %v1459_v21 }
 0xaa1   :  { %1183 = vmatpush.msra.mxu0 %v1467_v14 }
 0xaa2   :  { %1092 = vmatpush.msrb.mxu1 %v1458_v26 }
 0xb0a   :  { %v896_v40 = vpop.f32.mrf.mxu1 }
 0xb0b   :  { %927 = vrot.lane.b32.xlu1 %v896_v40, %s1598_s22  ;;  %v46_v40 = vld [vmem:[%s2092_s2 + $0xe] sm:$0x3] }
 0xb0c   :  { %v1018_v43 = vperm.slane %v46_v40, 0 }
 0xb11   :  { %v844_v44 = vpop.f32.mrf.mxu2 }
 0xb1a   :  { %v922_v42 = vpop.f32.mrf.mxu0 }
 0xb1b   :  { %929 = vrot.lane.b32.xlu0 %v922_v42, %s1598_s22 }
 0xb21   :  { %v870_v47 = vpop.f32.mrf.mxu3 }
 0xb7d   :  { %v928_v45 = vpop.permute.xlu1 %927 }
 0xb7e   :  { %v933_v46 = vsel %vm67_vm0, %v844_v44, %v928_v45 }
 0xb7f   :  { %1447 = vmatmul.msk.f32.vlgmr.msra.gmra.mxu2 %vm105_vm3, %v933_v46  ;;  %v1022_v46 = vperm.slane %v46_v40, 1 }
 0xb8d   :  { %v930_v20 = vpop.permute.xlu0 %929 }
 0xb8e   :  { %v934_v49 = vsel %vm67_vm0, %v870_v47, %v930_v20 }
 0xb8f   :  { %1448 = vmatmul.msk.f32.gmra.mxu2 %vm105_vm3, %v934_v49  ;;  %v1457_v49 = vld [vmem:[%s2096_s6 + $0x50] sm:$0xff] }
 0xb90   :  { %1093 = vmatpush.msrb.mxu1 %v1457_v49 }
 0xc02   :  { %v965_v51 = vpop.f32.mrf.mxu2 }
 0xc03   :  { %v966_v23 = vadd.f32 %v1506_v50, %v965_v51  ;;  %v1455_v51 = vld [vmem:[%s2096_s6 + $0x40] sm:$0xff] }
 0xc05   :  { %v971_v52 = vadd.f32 %v966_v23, %v1847_v34  ;;  %v1507_v23 = vld [vmem:[%s2099_s9 + $0x8] ss:$0 sm:$0xff] }
 0xc07   :  { %v973_v53 = vsel %vm105_vm3, %v971_v52, 0.0 }
 0xc08   :  { %974 = vadd.xlane.f32.xlu1 %v973_v53 }
 0xc12   :  { %v968_v54 = vpop.f32.mrf.mxu2 }
 0xc13   :  { %v969_v55 = vadd.f32 %v1506_v50, %v968_v54  ;;  %v1456_v50 = vld [vmem:[%s2096_s6 + $0x48] sm:$0xff] }
 0xc14   :  { %1094 = vmatpush.msrb.mxu1 %v1456_v50  ;;  %v47_v50 = vld [vmem:[%s2092_s2 + $0x10] sm:$0x3] }
 0xc15   :  { %v972_v56 = vadd.f32 %v969_v55, %v1851_v41  ;;  %v1452_v41 = vld [vmem:[%s2095_s5 + $0x38] sm:$0xff] }
 0xc16   :  { %1050 = vmatpush.msrb.mxu3 %v1452_v41  ;;  %1095 = vmatpush.msrb.mxu1 %v1455_v51 }
 0xc17   :  { %v976_v57 = vsel %vm105_vm3, %v972_v56, 0.0 }
 0xc18   :  { %977 = vadd.xlane.f32.xlu0 %v976_v57  ;;  %1051 = vmatpush.msrb.mxu3 %v1451_v3 }
 0xc1a   :  { %1052 = vmatpush.msrb.mxu3 %v1450_v4 }
 0xc1c   :  { %1053 = vmatpush.msrb.mxu3 %v1449_v5 }
 0xc7b   :  { %v975_v58 = vpop.xlane.xlu1 %974 }
 0xc7c   :  { %v979_v59 = vmul.f32 %v975_v58, %v1761_v48  ;;  %v1508_v58 = vld [vmem:[%s2099_s9 + $0x9] ss:$0 sm:$0xff] }
 0xc7e   :  { %v981_v60 = vsub.f32 %v971_v52, %v979_v59 }
 0xc80   :  { %v983_v61 = vmul.f32 %v981_v60, %v981_v60 }
 0xc82   :  { %v985_v62 = vsel %vm105_vm3, %v983_v61, 0.0 }
 0xc83   :  { %986 = vadd.xlane.f32.xlu2 %v985_v62 }
 0xc8b   :  { %v978_v63 = vpop.xlane.xlu0 %977 }
 0xc8c   :  { %v980_v34 = vmul.f32 %v978_v63, %v1761_v48 }
 0xc8e   :  { %v982_v0 = vsub.f32 %v972_v56, %v980_v34 }
 0xc90   :  { %v984_v1 = vmul.f32 %v982_v0, %v982_v0 }
 0xc92   :  { %v988_v2 = vsel %vm105_vm3, %v984_v1, 0.0 }
 0xc93   :  { %989 = vadd.xlane.f32.xlu1 %v988_v2 }
 0xcf6   :  { %v987_v6 = vpop.xlane.xlu2 %986 }
 0xcf7   :  { %v991_v7 = vmul.f32 %v987_v6, %v1761_v48 }
 0xcf9   :  { %v993_v8 = vadd.f32 1e-05, %v991_v7 }
 0xcfb   :  { %1554 = vrsqrt.f32 %v993_v8  ;;  %vm1001_vm6 = vweird.f32 %v993_v8 }
 0xd01   :  { %v1555_v9 = vpop.eup %1554 }
 0xd02   :  { %v996_v11 = vmul.f32 %v1555_v9, %v993_v8  ;;  %vm1002_vm4 = vweird.f32 %v1555_v9 }
 0xd03   :  { %vm1003_vm7 = vmor %vm1001_vm6, %vm1002_vm4 }
 0xd04   :  { %v997_v15 = vmul.f32 %v1555_v9, %v996_v11 }
 0xd06   :  { %v998_v17 = vmul.f32 0.5, %v997_v15  ;;  %v990_v18 = vpop.xlane.xlu1 %989  ;;  %v1466_v15 = vld [vmem:[%s2095_s5 + $0x48] sm:$0xff] }
 0xd07   :  { %v992_v19 = vmul.f32 %v990_v18, %v1761_v48  ;;  %1184 = vmatpush.msra.mxu0 %v1466_v15 }
 0xd08   :  { %v999_v24 = vsub.f32 1.5, %v998_v17 }
 0xd09   :  { %v994_v25 = vadd.f32 1e-05, %v992_v19  ;;  %1185 = vmatpush.msra.mxu0 %v1465_v16 }
 0xd0a   :  { %v1000_v27 = vmul.f32 %v1555_v9, %v999_v24  ;;  %v1478_v24 = vld [vmem:[%s2096_s6 + $0xb8] sm:$0xff] }
 0xd0b   :  { %1556 = vrsqrt.f32 %v994_v25  ;;  %vm1011_vm9 = vweird.f32 %v994_v25  ;;  %1220 = vmatpush.msrb.mxu2 %v1478_v24  ;;  %v1292_v24 = vld [vmem:[%s2098_s8 + $0x18] sm:$0xff] }
 0xd0c   :  { %v1004_v29 = vsel %vm1003_vm7, %v1555_v9, %v1000_v27  ;;  %v1476_v27 = vld [vmem:[%s2096_s6 + $0xa8] sm:$0xff]  ;;  %1313 = vmatpush.msra.mxu3 %v1292_v24 }
 0xd0d   :  { %v1015_v30 = vmul.f32 %v1004_v29, %v981_v60 }
 0xd0f   :  { %v1019_v32 = vmul.f32 %v1017_v28, %v1015_v30 }
 0xd11   :  { %v1557_v33 = vpop.eup %1556  ;;  %v1023_v35 = vadd.f32 %v1021_v31, %v1019_v32  ;;  %v1475_v31 = vld [vmem:[%s2096_s6 + $0xa0] sm:$0xff] }
 0xd12   :  { %v1006_v36 = vmul.f32 %v1557_v33, %v994_v25  ;;  %vm1012_vm8 = vweird.f32 %v1557_v33  ;;  %v1477_v25 = vld [vmem:[%s2096_s6 + $0xb0] sm:$0xff]  ;;  %v42_v32 = vld [vmem:[%s2092_s2 + $0x6] sm:$0x3] }
 0xd13   :  { %1453 = vmatmul.msk.f32.vlgmr.msrb.gmra.mxu3 %vm105_vm3, %v1023_v35  ;;  %vm1013_vm10 = vmor %vm1011_vm9, %vm1012_vm8  ;;  %1221 = vmatpush.msrb.mxu2 %v1477_v25  ;;  %v1291_v25 = vld [vmem:[%s2098_s8 + $0x10] sm:$0xff] }
 0xd14   :  { %v1007_v37 = vmul.f32 %v1557_v33, %v1006_v36  ;;  %v1474_v36 = vld [vmem:[%s2096_s6 + $0x98] sm:$0xff]  ;;  %1314 = vmatpush.msra.mxu3 %v1291_v25 }
 0xd15   :  { %1222 = vmatpush.msrb.mxu2 %v1476_v27  ;;  %v1289_v27 = vld [vmem:[%s2098_s8] sm:$0xff] }
 0xd16   :  { %v1008_v38 = vmul.f32 0.5, %v1007_v37 }
 0xd17   :  { %1223 = vmatpush.msrb.mxu2 %v1475_v31 }
 0xd18   :  { %v1009_v39 = vsub.f32 1.5, %v1008_v38  ;;  %v1149_v38 = vperm.slane %v42_v32, 0 }
 0xd19   :  { %1224 = vmatpush.msrb.mxu2 %v1474_v36 }
 0xd1a   :  { %v1010_v42 = vmul.f32 %v1557_v33, %v1009_v39 }
 0xd1c   :  { %v1014_v44 = vsel %vm1013_vm10, %v1557_v33, %v1010_v42  ;;  %v1153_v42 = vperm.slane %v42_v32, 1  ;;  %vm1329_vm10 = vcmask 1041409  }
 0xd1d   :  { %v1016_v45 = vmul.f32 %v1014_v44, %v982_v0 }
 0xd1f   :  { %v1020_v47 = vmul.f32 %v1018_v43, %v1016_v45 }
 0xd21   :  { %v1024_v20 = vadd.f32 %v1022_v46, %v1020_v47 }
 0xd23   :  { %1454 = vmatmul.msk.f32.gmra.mxu3 %vm105_vm3, %v1024_v20 }
 0xd96   :  { %v1055_v52 = vpop.f32.mrf.mxu3 }
 0xd97   :  { %v1056_v53 = vadd.f32 %v1507_v23, %v1055_v52 }
 0xd99   :  { %v1061_v54 = vmax.f32 %v1056_v53, 0.0 }
 0xd9b   :  { %1463 = vmatmul.msk.f32.vlgmr.msrb.gmra.mxu1 %vm547_vm12, %v1061_v54  ;;  %v1154_v54 = vperm.slane %v47_v50, 1 }
 0xda6   :  { %v1058_v55 = vpop.f32.mrf.mxu3 }
 0xda7   :  { %v1059_v56 = vadd.f32 %v1507_v23, %v1058_v55  ;;  %v1150_v23 = vperm.slane %v47_v50, 0 }
 0xda9   :  { %v1062_v57 = vmax.f32 %v1059_v56, 0.0 }
 0xdab   :  { %1464 = vmatmul.msk.f32.gmra.mxu1 %vm547_vm12, %v1062_v57  ;;  %v1473_v57 = vld [vmem:[%s2096_s6 + $0x90] sm:$0xff] }
 0xdac   :  { %1225 = vmatpush.msrb.mxu2 %v1473_v57 }
 0xe18   :  { %v1097_v59 = vpop.f32.mrf.mxu1 }
 0xe19   :  { %v1098_v60 = vadd.f32 %v1508_v58, %v1097_v59  ;;  %v1471_v59 = vld [vmem:[%s2096_s6 + $0x80] sm:$0xff] }
 0xe1b   :  { %v1103_v61 = vadd.f32 %v1098_v60, %v1023_v35  ;;  %v1509_v60 = vld [vmem:[%s2099_s9 + $0xa] ss:$0 sm:$0xff] }
 0xe1d   :  { %v1105_v62 = vsel %vm105_vm3, %v1103_v61, 0.0 }
 0xe1e   :  { %1106 = vadd.xlane.f32.xlu0 %v1105_v62 }
 0xe28   :  { %v1100_v63 = vpop.f32.mrf.mxu1 }
 0xe29   :  { %v1101_v34 = vadd.f32 %v1508_v58, %v1100_v63  ;;  %v1472_v58 = vld [vmem:[%s2096_s6 + $0x88] sm:$0xff] }
 0xe2a   :  { %1226 = vmatpush.msrb.mxu2 %v1472_v58 }
 0xe2b   :  { %v1104_v0 = vadd.f32 %v1101_v34, %v1024_v20 }
 0xe2c   :  { %1227 = vmatpush.msrb.mxu2 %v1471_v59 }
 0xe2d   :  { %v1108_v1 = vsel %vm105_vm3, %v1104_v0, 0.0 }
 0xe2e   :  { %1109 = vadd.xlane.f32.xlu1 %v1108_v1 }
 0xe91   :  { %v1107_v2 = vpop.xlane.xlu0 %1106 }
 0xe92   :  { %v1111_v41 = vmul.f32 %v1107_v2, %v1761_v48  ;;  %v1510_v2 = vld [vmem:[%s2099_s9 + $0xb] ss:$0 sm:$0xff] }
 0xe94   :  { %v1113_v3 = vsub.f32 %v1103_v61, %v1111_v41 }
 0xe96   :  { %v1115_v4 = vmul.f32 %v1113_v3, %v1113_v3 }
 0xe98   :  { %v1117_v5 = vsel %vm105_vm3, %v1115_v4, 0.0 }
 0xe99   :  { %1118 = vadd.xlane.f32.xlu0 %v1117_v5 }
 0xea1   :  { %v1110_v6 = vpop.xlane.xlu1 %1109 }
 0xea2   :  { %v1112_v7 = vmul.f32 %v1110_v6, %v1761_v48 }
 0xea4   :  { %v1114_v8 = vsub.f32 %v1104_v0, %v1112_v7 }
 0xea6   :  { %v1116_v9 = vmul.f32 %v1114_v8, %v1114_v8 }
 0xea8   :  { %v1120_v11 = vsel %vm105_vm3, %v1116_v9, 0.0 }
 0xea9   :  { %1121 = vadd.xlane.f32.xlu2 %v1120_v11 }
 0xf0c   :  { %v1119_v17 = vpop.xlane.xlu0 %1118 }
 0xf0d   :  { %v1123_v18 = vmul.f32 %v1119_v17, %v1761_v48 }
 0xf0f   :  { %v1125_v19 = vadd.f32 1e-05, %v1123_v18 }
 0xf11   :  { %1558 = vrsqrt.f32 %v1125_v19  ;;  %vm1133_vm13 = vweird.f32 %v1125_v19 }
 0xf17   :  { %v1559_v21 = vpop.eup %1558 }
 0xf18   :  { %v1128_v22 = vmul.f32 %v1559_v21, %v1125_v19  ;;  %vm1134_vm11 = vweird.f32 %v1559_v21 }
 0xf19   :  { %vm1135_vm14 = vmor %vm1133_vm13, %vm1134_vm11  ;;  %vm1375_vm11 = vcmask 392192   ;;  %vm1378_vm13 = vcmask 654336  }
 0xf1a   :  { %v1129_v26 = vmul.f32 %v1559_v21, %v1128_v22 }
 0xf1c   :  { %v1130_v28 = vmul.f32 0.5, %v1129_v26  ;;  %v1122_v29 = vpop.xlane.xlu2 %1121  ;;  %v1290_v26 = vld [vmem:[%s2098_s8 + $0x8] sm:$0xff] }
 0xf1d   :  { %v1124_v30 = vmul.f32 %v1122_v29, %v1761_v48  ;;  %1315 = vmatpush.msra.mxu3 %v1290_v26 }
 0xf1e   :  { %v1131_v33 = vsub.f32 1.5, %v1130_v28 }
 0xf1f   :  { %v1126_v35 = vadd.f32 1e-05, %v1124_v30  ;;  %1316 = vmatpush.msra.mxu3 %v1289_v27 }
 0xf20   :  { %v1132_v37 = vmul.f32 %v1559_v21, %v1131_v33 }
 0xf21   :  { %1560 = vrsqrt.f32 %v1126_v35  ;;  %vm1143_vm1 = vweird.f32 %v1126_v35 }
 0xf22   :  { %v1136_v39 = vsel %vm1135_vm14, %v1559_v21, %v1132_v37  ;;  %vm1380_vm14 = vcmask 785408  }
 0xf23   :  { %v1147_v40 = vmul.f32 %v1136_v39, %v1113_v3 }
 0xf25   :  { %v1151_v43 = vmul.f32 %v1149_v38, %v1147_v40  ;;  %v43_v38 = vld [vmem:[%s2092_s2 + $0x8] sm:$0x3] }
 0xf27   :  { %v1561_v44 = vpop.eup %1560  ;;  %v1155_v45 = vadd.f32 %v1153_v42, %v1151_v43  ;;  %v1281_v43 = vperm.slane %v43_v38, 0 }
 0xf28   :  { %v1138_v46 = vmul.f32 %v1561_v44, %v1126_v35  ;;  %vm1144_vm15 = vweird.f32 %v1561_v44 }
 0xf29   :  { %1469 = vmatmul.msk.f32.vlgmr.msra.gmra.mxu0 %vm105_vm3, %v1155_v45  ;;  %vm1145_vm2 = vmor %vm1143_vm1, %vm1144_vm15  ;;  %vm1382_vm15 = vcmask 916480  }
 0xf2a   :  { %v1139_v47 = vmul.f32 %v1561_v44, %v1138_v46  ;;  %v1285_v46 = vperm.slane %v43_v38, 1 }
 0xf2c   :  { %v1140_v20 = vmul.f32 0.5, %v1139_v47 }
 0xf2e   :  { %v1141_v49 = vsub.f32 1.5, %v1140_v20 }
 0xf30   :  { %v1142_v51 = vmul.f32 %v1561_v44, %v1141_v49 }
 0xf32   :  { %v1146_v52 = vsel %vm1145_vm2, %v1561_v44, %v1142_v51 }
 0xf33   :  { %v1148_v53 = vmul.f32 %v1146_v52, %v1114_v8  ;;  %v48_v52 = vld [vmem:[%s2092_s2 + $0x12] sm:$0x3]  ;;  %s1600_s2 = smov 48  }
 0xf34   :  { %v1286_v57 = vperm.slane %v48_v52, 1 }
 0xf35   :  { %v1152_v55 = vmul.f32 %v1150_v23, %v1148_v53 }
 0xf37   :  { %v1156_v56 = vadd.f32 %v1154_v54, %v1152_v55  ;;  %v1282_v54 = vperm.slane %v48_v52, 0 }
 0xf39   :  { %1470 = vmatmul.msk.f32.gmra.mxu0 %vm105_vm3, %v1156_v56 }
 0xfa6   :  { %v1187_v61 = vpop.f32.mrf.mxu0 }
 0xfa7   :  { %v1188_v62 = vadd.f32 %v1509_v60, %v1187_v61 }
 0xfa9   :  { %v1193_v63 = vmax.f32 %v1188_v62, 0.0 }
 0xfab   :  { %1479 = vmatmul.msk.f32.vlgmr.msrb.gmra.mxu2 %vm547_vm12, %v1193_v63 }
 0xfb6   :  { %v1190_v34 = vpop.f32.mrf.mxu0 }
 0xfb7   :  { %v1191_v0 = vadd.f32 %v1509_v60, %v1190_v34  ;;  %v1511_v60 = vld [vmem:[%s2099_s9 + $0x1] ss:$0 sm:$0xff]  ;;  %s1601_s9 = smov 32  }
 0xfb9   :  { %v1194_v1 = vmax.f32 %v1191_v0, 0.0 }
 0xfbb   :  { %1480 = vmatmul.msk.f32.gmra.mxu2 %vm547_vm12, %v1194_v1 }
0x102e   :  { %v1229_v41 = vpop.f32.mrf.mxu2 }
0x102f   :  { %v1230_v3 = vadd.f32 %v1510_v2, %v1229_v41 }
0x1031   :  { %v1235_v4 = vadd.f32 %v1230_v3, %v1155_v45 }
0x1033   :  { %v1237_v5 = vsel %vm105_vm3, %v1235_v4, 0.0 }
0x1034   :  { %1238 = vadd.xlane.f32.xlu1 %v1237_v5 }
0x103e   :  { %v1232_v6 = vpop.f32.mrf.mxu2 }
0x103f   :  { %v1233_v7 = vadd.f32 %v1510_v2, %v1232_v6 }
0x1041   :  { %v1236_v8 = vadd.f32 %v1233_v7, %v1156_v56 }
0x1043   :  { %v1240_v9 = vsel %vm105_vm3, %v1236_v8, 0.0 }
0x1044   :  { %1241 = vadd.xlane.f32.xlu0 %v1240_v9 }
0x10a7   :  { %v1239_v11 = vpop.xlane.xlu1 %1238 }
0x10a8   :  { %v1243_v13 = vmul.f32 %v1239_v11, %v1761_v48 }
0x10aa   :  { %v1245_v14 = vsub.f32 %v1235_v4, %v1243_v13 }
0x10ac   :  { %v1247_v15 = vmul.f32 %v1245_v14, %v1245_v14 }
0x10ae   :  { %v1249_v16 = vsel %vm105_vm3, %v1247_v15, 0.0 }
0x10af   :  { %1250 = vadd.xlane.f32.xlu2 %v1249_v16 }
0x10b7   :  { %v1242_v17 = vpop.xlane.xlu0 %1241 }
0x10b8   :  { %v1244_v18 = vmul.f32 %v1242_v17, %v1761_v48 }
0x10ba   :  { %v1246_v19 = vsub.f32 %v1236_v8, %v1244_v18 }
0x10bc   :  { %v1248_v21 = vmul.f32 %v1246_v19, %v1246_v19 }
0x10be   :  { %v1252_v22 = vsel %vm105_vm3, %v1248_v21, 0.0 }
0x10bf   :  { %1253 = vadd.xlane.f32.xlu1 %v1252_v22 }
0x1122   :  { %v1251_v28 = vpop.xlane.xlu2 %1250 }
0x1123   :  { %v1255_v29 = vmul.f32 %v1251_v28, %v1761_v48 }
0x1125   :  { %v1257_v30 = vadd.f32 1e-05, %v1255_v29 }
0x1127   :  { %1562 = vrsqrt.f32 %v1257_v30  ;;  %vm1265_vm4 = vweird.f32 %v1257_v30 }
0x112d   :  { %v1563_v31 = vpop.eup %1562 }
0x112e   :  { %v1260_v32 = vmul.f32 %v1563_v31, %v1257_v30  ;;  %vm1266_vm5 = vweird.f32 %v1563_v31 }
0x112f   :  { %vm1267_vm6 = vmor %vm1265_vm4, %vm1266_vm5 }
0x1130   :  { %v1261_v33 = vmul.f32 %v1563_v31, %v1260_v32 }
0x1132   :  { %v1262_v35 = vmul.f32 0.5, %v1261_v33  ;;  %v1254_v36 = vpop.xlane.xlu1 %1253 }
0x1133   :  { %v1256_v37 = vmul.f32 %v1254_v36, %v1761_v48 }
0x1134   :  { %v1263_v39 = vsub.f32 1.5, %v1262_v35 }
0x1135   :  { %v1258_v40 = vadd.f32 1e-05, %v1256_v37 }
0x1136   :  { %v1264_v42 = vmul.f32 %v1563_v31, %v1263_v39 }
0x1137   :  { %1564 = vrsqrt.f32 %v1258_v40  ;;  %vm1275_vm8 = vweird.f32 %v1258_v40 }
0x1138   :  { %v1268_v44 = vsel %vm1267_vm6, %v1563_v31, %v1264_v42 }
0x1139   :  { %v1279_v45 = vmul.f32 %v1268_v44, %v1245_v14 }
0x113b   :  { %v1283_v47 = vmul.f32 %v1281_v43, %v1279_v45 }
0x113d   :  { %v1565_v20 = vpop.eup %1564  ;;  %v1287_v49 = vadd.f32 %v1285_v46, %v1283_v47 }
0x113e   :  { %v1270_v50 = vmul.f32 %v1565_v20, %v1258_v40  ;;  %vm1276_vm7 = vweird.f32 %v1565_v20 }
0x113f   :  { %1481 = vmatmul.msk.f32.vlgmr.msra.gmra.mxu3 %vm105_vm3, %v1287_v49  ;;  %vm1277_vm9 = vmor %vm1275_vm8, %vm1276_vm7 }
0x1140   :  { %v1271_v48 = vmul.f32 %v1565_v20, %v1270_v50 }
0x1142   :  { %v1272_v51 = vmul.f32 0.5, %v1271_v48 }
0x1144   :  { %v1273_v23 = vsub.f32 1.5, %v1272_v51 }
0x1146   :  { %v1274_v53 = vmul.f32 %v1565_v20, %v1273_v23 }
0x1148   :  { %v1278_v55 = vsel %vm1277_vm9, %v1565_v20, %v1274_v53 }
0x1149   :  { %v1280_v56 = vmul.f32 %v1278_v55, %v1246_v19 }
0x114b   :  { %v1284_v58 = vmul.f32 %v1282_v54, %v1280_v56 }
0x114d   :  { %v1288_v59 = vadd.f32 %v1286_v57, %v1284_v58 }
0x114f   :  { %1482 = vmatmul.msk.f32.gmra.mxu3 %vm105_vm3, %v1288_v59 }
0x11c2   :  { %v1318_v61 = vpop.f32.mrf.mxu3 }
0x11c3   :  { %v1319_v62 = vadd.f32 %v1511_v60, %v1318_v61 }
0x11c5   :  { %v1324_v63 = vadd.f32 %v1673_v10, %v1319_v62 }
0x11c7   :  { %v1332_v2 = vrot.slane %v1324_v63, 1  ;;  %v1343_v41 = vrot.slane %v1324_v63, 3  ;;  %v1337_v5 = vrot.slane %v1324_v63, 2  ;;  %v1349_v11 = vrot.slane %v1324_v63, 4 }
0x11c8   :  { %v1367_v16 = vrot.slane %v1324_v63, 7  ;;  %v1355_v17 = vrot.slane %v1324_v63, 5  ;;  %v1361_v22 = vrot.slane %v1324_v63, 6 }
0x11d2   :  { %v1321_v34 = vpop.f32.mrf.mxu3 }
0x11d3   :  { %v1322_v0 = vadd.f32 %v1511_v60, %v1321_v34 }
0x11d5   :  { %v1325_v1 = vadd.f32 %v1677_v12, %v1322_v0 }
0x11d7   :  { %v1333_v3 = vsel %vm1329_vm10, %v1325_v1, %v1332_v2  ;;  %v1344_v4 = vrot.slane %v1325_v1, 2  ;;  %v1338_v6 = vrot.slane %v1325_v1, 1  ;;  %v1328_v7 = vrot.slane %v1325_v1, 7 }
0x11d8   :  { %1334 = vrot.lane.b32.xlu0 %v1333_v3, %s1598_s22  ;;  %v1350_v10 = vrot.slane %v1325_v1, 3  ;;  %v1368_v13 = vrot.slane %v1325_v1, 6  ;;  %v1356_v14 = vrot.slane %v1325_v1, 4  ;;  %v1362_v21 = vrot.slane %v1325_v1, 5 }
0x11d9   :  { %v1345_v8 = vsel %vm1329_vm10, %v1344_v4, %v1343_v41  ;;  %v1339_v9 = vsel %vm1329_vm10, %v1338_v6, %v1337_v5  ;;  %v1330_v12 = vsel %vm1329_vm10, %v1328_v7, %v1324_v63 }
0x11da   :  { %1346 = vrot.lane.b32.xlu1 %v1345_v8, %s1600_s2  ;;  %1340 = vrot.lane.b32.xlu2 %v1339_v9, %s1601_s9  ;;  %v1351_v15 = vsel %vm1329_vm10, %v1350_v10, %v1349_v11  ;;  %v1369_v18 = vsel %vm1329_vm10, %v1368_v13, %v1367_v16  ;;  %v1357_v19 = vsel %vm1329_vm10, %v1356_v14, %v1355_v17 }
0x11db   :  { %v1363_v24 = vsel %vm1329_vm10, %v1362_v21, %v1361_v22 }
0x11e0   :  { %1352 = vrot.lane.b32.xlu0 %v1351_v15, %s1597_s15 }
0x11e2   :  { %1370 = vrot.lane.b32.xlu1 %v1369_v18, %s1594_s1  ;;  %1358 = vrot.lane.b32.xlu2 %v1357_v19, %s1596_s14  ;;  %s1602_s1 = smov [#allocation2]  }
0x11e3   :  { %s1390_s14 = sshll.u32 %s1602_s1, 4  ;;  %s1391_s14 = int_to_ptr.vmem [resolvable:$true] %s1390_s14 }
0x11e8   :  { %1364 = vrot.lane.b32.xlu0 %v1363_v24, %s1595_s13  ;;  %s1392_s13 = sshll.u32 %s2100_s10, 4  ;;  %s1393_s13 = int_to_ptr.hbm [resolvable:$true] %s1392_s13 }
0x1234   :  { %v1341_v26 = vpop.permute.xlu2 %1340 }
0x123c   :  { %v1359_v33 = vpop.permute.xlu2 %1358 }
0x124a   :  { %v1335_v25 = vpop.permute.xlu0 %1334 }
0x124b   :  { %v1373_v27 = vsel %vm67_vm0, %v1330_v12, %v1335_v25 }
0x124c   :  { %v1347_v28 = vpop.permute.xlu1 %1346  ;;  %v1374_v30 = vsel %vm105_vm3, %v1373_v27, %v1341_v26 }
0x124d   :  { %v1376_v31 = vsel %vm1375_vm11, %v1374_v30, %v1347_v28 }
0x1252   :  { %v1353_v29 = vpop.permute.xlu0 %1352 }
0x1253   :  { %v1377_v32 = vsel %vm547_vm12, %v1376_v31, %v1353_v29 }
0x1254   :  { %v1379_v36 = vsel %vm1378_vm13, %v1377_v32, %v1359_v33  ;;  %v1371_v37 = vpop.permute.xlu1 %1370 }
0x125a   :  { %v1365_v35 = vpop.permute.xlu0 %1364 }
0x125b   :  { %v1381_v38 = vsel %vm1380_vm14, %v1379_v36, %v1365_v35 }
0x125c   :  { %v1383_v39 = vsel %vm1382_vm15, %v1381_v38, %v1371_v37 }
0x125d   :  { %1384 = vst [vmem:[#allocation2] sm:$0x3] %v1383_v39 }
0x125e   :  { %1395 = dma.vmem_to_hbm [thread:$0]  %s1391_s14, 32, %s1393_s13, [#allocation3]  }
0x125f   :  { %1590 = dma.done.wait [#allocation3], 32  }
0x1260   :  { %1591 = vsyncadd [#allocation3], 4294967264 }
0x1261   :  { %1400 = vsyncpa [#allocation3], 1 }

</bundles_post_ra>
